<compile_context>
chip_gen: v6e
topology: v6e:2x2x1
jax: 0.10.0
libtpu: 0.0.40
codegen_flags: <defaults>
</compile_context>

<pallas_src>
import jax
import jax.numpy as jnp
from jax.experimental import pallas as pl
from jax.experimental.pallas import tpu as pltpu

_VMEM_LIMIT_BYTES = 32 * 1024 * 1024
_BN_EPS = 1e-5


def _round_up(x, m):
    return ((x + m - 1) // m) * m


def _full_spec(arr):
    # Full-array block, constant index_map -> stays resident in VMEM across grid.
    return pl.BlockSpec(arr.shape, lambda i: (0,) * arr.ndim)


# ----------------------------------------------------------------------------
# Pallas kernels
# ----------------------------------------------------------------------------
def _matmul_affine_relu_kernel(a_ref, w_ref, s_ref, b_ref, o_ref):
    # y = relu((a @ w) * scale + bias); f32 accumulation, store in o_ref.dtype.
    z = jnp.dot(a_ref[...], w_ref[...], preferred_element_type=jnp.float32)
    y = jnp.maximum(z * s_ref[...] + b_ref[...], 0.0)
    o_ref[...] = y.astype(o_ref.dtype)


def _fc_stack_kernel(x_ref, w1_ref, s1_ref, b1_ref, w2_ref, s2_ref, b2_ref,
                     w3_ref, b3_ref, o_ref):
    # Fused fc1+bn4+relu -> fc2+bn5+relu -> fc3 -> log_softmax (all in VMEM).
    w1 = w1_ref[...]
    w2 = w2_ref[...]
    w3 = w3_ref[...]
    h = jnp.dot(x_ref[...], w1, preferred_element_type=jnp.float32)
    h = jnp.maximum(h * s1_ref[...] + b1_ref[...], 0.0)
    h = jnp.dot(h.astype(w2.dtype), w2, preferred_element_type=jnp.float32)
    h = jnp.maximum(h * s2_ref[...] + b2_ref[...], 0.0)
    z = jnp.dot(h.astype(w3.dtype), w3, preferred_element_type=jnp.float32)
    z = z + b3_ref[...]
    m = jnp.max(z, axis=1, keepdims=True)
    lse = jnp.log(jnp.sum(jnp.exp(z - m), axis=1, keepdims=True)) + m
    o_ref[...] = (z - lse).astype(o_ref.dtype)


# ----------------------------------------------------------------------------
# pallas_call wrappers
# ----------------------------------------------------------------------------
def fused_matmul_affine_relu(a, w, scale, bias, *, block_m=1024,
                             out_dtype=jnp.bfloat16):
    """a: [M, K], w: [K, OC] (bf16), scale/bias: [1, OC] f32 -> [M, OC]."""
    M, K = a.shape
    OC = w.shape[1]
    bm = min(block_m, _round_up(M, 8))
    Mp = _round_up(M, bm)
    if Mp != M:
        a = jnp.pad(a, ((0, Mp - M), (0, 0)))
    bytes_accessed = (Mp * K * a.dtype.itemsize + K * OC * w.dtype.itemsize
                      + 2 * OC * 4 + Mp * OC * jnp.dtype(out_dtype).itemsize)
    out = pl.pallas_call(
        _matmul_affine_relu_kernel,
        out_shape=jax.ShapeDtypeStruct((Mp, OC), out_dtype),
        grid_spec=pltpu.PrefetchScalarGridSpec(
            num_scalar_prefetch=0,
            grid=(Mp // bm,),
            in_specs=[
                pl.BlockSpec((bm, K), lambda i: (i, 0)),   # activation row tiles
                _full_spec(w),                             # weights resident
                _full_spec(scale),
                _full_spec(bias),
            ],
            out_specs=pl.BlockSpec((bm, OC), lambda i: (i, 0)),
        ),
        compiler_params=pltpu.CompilerParams(
            dimension_semantics=("parallel",),
            vmem_limit_bytes=_VMEM_LIMIT_BYTES,
        ),
        cost_estimate=pl.CostEstimate(
            flops=2 * Mp * K * OC,
            transcendentals=0,
            bytes_accessed=int(bytes_accessed),
        ),
    )(a, w, scale, bias)
    return out if Mp == M else out[:M]


def fused_fc_stack(x, w1, s1, b1, w2, s2, b2, w3, b3, *, block_m=256):
    """x: [N, 640] -> log_softmax of the full FC head, [N, 10] f32."""
    M, K = x.shape
    n_out = w3.shape[1]
    bm = min(block_m, _round_up(M, 8))
    Mp = _round_up(M, bm)
    if Mp != M:
        x = jnp.pad(x, ((0, Mp - M), (0, 0)))
    flops = 2 * Mp * (K * w1.shape[1] + w1.shape[1] * w2.shape[1]
                      + w2.shape[1] * n_out)
    w_bytes = sum(int(a.size) * a.dtype.itemsize
                  for a in (w1, s1, b1, w2, s2, b2, w3, b3))
    out = pl.pallas_call(
        _fc_stack_kernel,
        out_shape=jax.ShapeDtypeStruct((Mp, n_out), jnp.float32),
        grid_spec=pltpu.PrefetchScalarGridSpec(
            num_scalar_prefetch=0,
            grid=(Mp // bm,),
            in_specs=[
                pl.BlockSpec((bm, K), lambda i: (i, 0)),   # batch-row tiles
                _full_spec(w1), _full_spec(s1), _full_spec(b1),
                _full_spec(w2), _full_spec(s2), _full_spec(b2),
                _full_spec(w3), _full_spec(b3),
            ],
            out_specs=pl.BlockSpec((bm, n_out), lambda i: (i, 0)),
        ),
        compiler_params=pltpu.CompilerParams(
            dimension_semantics=("parallel",),
            vmem_limit_bytes=_VMEM_LIMIT_BYTES,
        ),
        cost_estimate=pl.CostEstimate(
            flops=int(flops),
            transcendentals=int(Mp * (n_out + 2)),
            bytes_accessed=int(Mp * K * x.dtype.itemsize + w_bytes
                               + Mp * n_out * 4),
        ),
    )(x, w1, s1, b1, w2, s2, b2, w3, b3)
    return out if Mp == M else out[:M]


# ----------------------------------------------------------------------------
# Glue: im2col (NHWC, tap order kh, kw, c) for 3x3 / stride-2 / pad-1 convs
# ----------------------------------------------------------------------------
def _im2col_s2_p1_k3_nhwc(x):
    """x: [N, H, W, C] -> patches [N*OH*OW, 9*C], OH, OW."""
    N, H, W, C = x.shape
    OH = (H + 2 - 3) // 2 + 1
    OW = (W + 2 - 3) // 2 + 1
    xp = jnp.pad(x, ((0, 0), (1, 1), (1, 1), (0, 0)))
    taps = [xp[:, i:i + 2 * OH:2, j:j + 2 * OW:2, :]
            for i in range(3) for j in range(3)]
    patches = jnp.concatenate(taps, axis=-1)              # [N, OH, OW, 9*C]
    return patches.reshape(N * OH * OW, 9 * C), OH, OW


def conv_bn_relu_nhwc(x, w2d, scale, bias, *, block_m=1024):
    """x: [N, H, W, C] -> relu(BN(conv(x))) as [N, OH, OW, OC] (bf16)."""
    N = x.shape[0]
    OC = w2d.shape[1]
    patches, OH, OW = _im2col_s2_p1_k3_nhwc(x)
    y = fused_matmul_affine_relu(patches.astype(w2d.dtype), w2d, scale, bias,
                                 block_m=block_m)
    return y.reshape(N, OH, OW, OC)


# ----------------------------------------------------------------------------
# Parameters: raw (PyTorch layout) init + one-time preparation (fold BN,
# permute/transpose/cast weights).
# ----------------------------------------------------------------------------
def init_params(key):
    ks = jax.random.split(key, 16)
    p = {}
    p["conv1_w"] = jax.random.normal(ks[0], (10, 1, 3, 3), jnp.float32) * 0.1
    p["conv1_b"] = jax.random.normal(ks[1], (10,), jnp.float32) * 0.1
    p["conv2_w"] = jax.random.normal(ks[2], (20, 10, 3, 3), jnp.float32) * 0.1
    p["conv2_b"] = jax.random.normal(ks[3], (20,), jnp.float32) * 0.1
    p["conv3_w"] = jax.random.normal(ks[4], (40, 20, 3, 3), jnp.float32) * 0.1
    p["conv3_b"] = jax.random.normal(ks[5], (40,), jnp.float32) * 0.1
    p["fc1_w"] = jax.random.normal(ks[6], (120, 640), jnp.float32) * 0.05
    p["fc1_b"] = jax.random.normal(ks[7], (120,), jnp.float32) * 0.05
    p["fc2_w"] = jax.random.normal(ks[8], (60, 120), jnp.float32) * 0.05
    p["fc2_b"] = jax.random.normal(ks[9], (60,), jnp.float32) * 0.05
    p["fc3_w"] = jax.random.normal(ks[10], (10, 60), jnp.float32) * 0.05
    p["fc3_b"] = jax.random.normal(ks[11], (10,), jnp.float32) * 0.05

    def bn(kg, kb, n):
        return (1.0 + 0.1 * jax.random.normal(kg, (n,), jnp.float32),   # gamma
                0.1 * jax.random.normal(kb, (n,), jnp.float32),         # beta
                jnp.zeros((n,), jnp.float32),                           # running_mean
                jnp.ones((n,), jnp.float32))                            # running_var

    p["bn1"] = bn(ks[12], ks[13], 10)
    p["bn2"] = bn(ks[14], ks[15], 20)
    k2 = jax.random.split(jax.random.fold_in(key, 99), 6)
    p["bn3"] = bn(k2[0], k2[1], 40)
    p["bn4"] = bn(k2[2], k2[3], 120)
    p["bn5"] = bn(k2[4], k2[5], 60)
    return p


def prepare_params(p, compute_dtype=jnp.bfloat16):
    """Fold BN into per-channel scale/bias and pre-layout weights (once)."""
    def fold(gamma, beta, mean, var, bias0):
        s = gamma / jnp.sqrt(var + _BN_EPS)
        b = (bias0 - mean) * s + beta
        return (s.reshape(1, -1).astype(jnp.float32),
                b.reshape(1, -1).astype(jnp.float32))

    q = {}
    # Conv weights: [OC, C, 3, 3] -> [(kh*3+kw)*C + c, OC]  (matches im2col order)
    for idx in (1, 2, 3):
        w = p[f"conv{idx}_w"]
        OC = w.shape[0]
        w2d = w.transpose(2, 3, 1, 0).reshape(-1, OC)
        g, be, m, v = p[f"bn{idx}"]
        s, b = fold(g, be, m, v, p[f"conv{idx}_b"])
        q[f"w{idx}"] = w2d.astype(compute_dtype)
        q[f"s{idx}"] = s
        q[f"b{idx}"] = b
    # fc1: permute input columns from PyTorch NCHW flatten (c,h,w) to NHWC (h,w,c)
    w1 = p["fc1_w"].reshape(120, 40, 4, 4).transpose(2, 3, 1, 0).reshape(640, 120)
    g, be, m, v = p["bn4"]
    q["fc1_s"], q["fc1_b"] = fold(g, be, m, v, p["fc1_b"])
    q["fc1_w"] = w1.astype(compute_dtype)
    g, be, m, v = p["bn5"]
    q["fc2_s"], q["fc2_b"] = fold(g, be, m, v, p["fc2_b"])
    q["fc2_w"] = p["fc2_w"].T.astype(compute_dtype)
    q["fc3_w"] = p["fc3_w"].T.astype(compute_dtype)
    q["fc3_b"] = p["fc3_b"].reshape(1, 10).astype(jnp.float32)
    return q


# ----------------------------------------------------------------------------
# Forward pass (ConvNet2.forward, eval-mode BN)
# ----------------------------------------------------------------------------
def convnet2_forward(q, x):
    """x: [N, 1, 28, 28] f32 NCHW (PyTorch layout) -> [N, 10] f32 log-probs."""
    x = jnp.transpose(x, (0, 2, 3, 1))                    # NHWC, once at the input
    x = conv_bn_relu_nhwc(x, q["w1"], q["s1"], q["b1"])   # [N, 14, 14, 10]
    x = conv_bn_relu_nhwc(x, q["w2"], q["s2"], q["b2"])   # [N,  7,  7, 20]
    x = conv_bn_relu_nhwc(x, q["w3"], q["s3"], q["b3"])   # [N,  4,  4, 40]
    x = x.reshape(x.shape[0], -1)                         # [N, 640] NHWC flatten (fc1_w pre-permuted)
    return fused_fc_stack(x, q["fc1_w"], q["fc1_s"], q["fc1_b"],
                          q["fc2_w"], q["fc2_s"], q["fc2_b"],
                          q["fc3_w"], q["fc3_b"])


if __name__ == "__main__":
    key = jax.random.PRNGKey(0)
    k_params, k_x = jax.random.split(key)
    raw_params = init_params(k_params)
    params = prepare_params(raw_params)

    # MNIST-shaped input (28x28 so the flatten yields 640 features)
    x = jax.random.normal(k_x, (2, 1, 28, 28), jnp.float32)

    fwd = jax.jit(convnet2_forward)
    out = jax.block_until_ready(fwd(params, x))

    assert out.shape == (2, 10)
    # log_softmax rows should sum to ~1 after exp
    assert jnp.allclose(jnp.exp(out).sum(axis=1), 1.0, atol=1e-4)
    print("KERNEL_OK")
</pallas_src>

<mosaic_0001>
module attributes {stable_mosaic.version = 11 : i64} {
  func.func @_matmul_affine_relu_kernel(%arg0: i32, %arg1: memref<392x9xbf16, #tpu.memory_space<vmem>>, %arg2: memref<9x10xbf16, #tpu.memory_space<vmem>>, %arg3: memref<1x10xf32, #tpu.memory_space<vmem>>, %arg4: memref<1x10xf32, #tpu.memory_space<vmem>>, %arg5: memref<392x10xbf16, #tpu.memory_space<vmem>>) attributes {dimension_semantics = [#tpu.dimension_semantics<parallel>], iteration_bounds = array<i64: 1>, scalar_prefetch = 0 : i64, scratch_operands = 0 : i64, tpu.core_type = #tpu.core_type<tc>, window_params = [{transform_indices = @transform_0, window_bounds = array<i64: 392, 9>}, {pipeline_mode = #tpu.pipeline_mode<synchronous>, transform_indices = @transform_1, window_bounds = array<i64: 9, 10>}, {pipeline_mode = #tpu.pipeline_mode<synchronous>, transform_indices = @transform_2, window_bounds = array<i64: 1, 10>}, {pipeline_mode = #tpu.pipeline_mode<synchronous>, transform_indices = @transform_3, window_bounds = array<i64: 1, 10>}, {transform_indices = @transform_4, window_bounds = array<i64: 392, 10>}]} {
    %c0 = arith.constant 0 : index
    %c0_0 = arith.constant 0 : index
    %0 = vector.load %arg1[%c0, %c0_0] : memref<392x9xbf16, #tpu.memory_space<vmem>>, vector<392x9xbf16>
    %c0_1 = arith.constant 0 : index
    %c0_2 = arith.constant 0 : index
    %1 = vector.load %arg2[%c0_1, %c0_2] : memref<9x10xbf16, #tpu.memory_space<vmem>>, vector<9x10xbf16>
    %cst = arith.constant dense<0.000000e+00> : vector<392x10xf32>
    %2 = tpu.matmul %0, %1, %cst {dimension_numbers = #tpu.dot_dimension_numbers<[1], [0], [0], [1], [0, 0, 1, 1], [], []>} : vector<392x9xbf16>, vector<9x10xbf16>, vector<392x10xf32> -> vector<392x10xf32>
    %c0_3 = arith.constant 0 : index
    %c0_4 = arith.constant 0 : index
    %3 = vector.load %arg3[%c0_3, %c0_4] : memref<1x10xf32, #tpu.memory_space<vmem>>, vector<1x10xf32>
    %4 = vector.broadcast %3 : vector<1x10xf32> to vector<392x10xf32>
    %5 = arith.mulf %2, %4 : vector<392x10xf32>
    %c0_5 = arith.constant 0 : index
    %c0_6 = arith.constant 0 : index
    %6 = vector.load %arg4[%c0_5, %c0_6] : memref<1x10xf32, #tpu.memory_space<vmem>>, vector<1x10xf32>
    %7 = vector.broadcast %6 : vector<1x10xf32> to vector<392x10xf32>
    %8 = arith.addf %5, %7 : vector<392x10xf32>
    %cst_7 = arith.constant 0.000000e+00 : f32
    %9 = vector.broadcast %cst_7 : f32 to vector<392x10xf32>
    %10 = arith.maximumf %8, %9 : vector<392x10xf32>
    %11 = arith.truncf %10 : vector<392x10xf32> to vector<392x10xbf16>
    %c0_8 = arith.constant 0 : index
    %c0_9 = arith.constant 0 : index
    %12 = vector.load %arg5[%c0_8, %c0_9] : memref<392x10xbf16, #tpu.memory_space<vmem>>, vector<392x10xbf16>
    tpu.vector_store %arg5[%c0_8, %c0_9], %11 {strides = array<i32>} : memref<392x10xbf16, #tpu.memory_space<vmem>>, vector<392x10xbf16>,
    return
  }
  func.func @transform_0(%arg0: i32) -> (i32, i32) {
    %c0_i32 = arith.constant 0 : i32
    %c0_i32_0 = arith.constant 0 : i32
    return %arg0, %c0_i32 : i32, i32
  }
  func.func @transform_1(%arg0: i32) -> (i32, i32) {
    %c0_i32 = arith.constant 0 : i32
    %c0_i32_0 = arith.constant 0 : i32
    %c0_i32_1 = arith.constant 0 : i32
    return %c0_i32, %c0_i32_0 : i32, i32
  }
  func.func @transform_2(%arg0: i32) -> (i32, i32) {
    %c0_i32 = arith.constant 0 : i32
    %c0_i32_0 = arith.constant 0 : i32
    %c0_i32_1 = arith.constant 0 : i32
    return %c0_i32, %c0_i32_0 : i32, i32
  }
  func.func @transform_3(%arg0: i32) -> (i32, i32) {
    %c0_i32 = arith.constant 0 : i32
    %c0_i32_0 = arith.constant 0 : i32
    %c0_i32_1 = arith.constant 0 : i32
    return %c0_i32, %c0_i32_0 : i32, i32
  }
  func.func @transform_4(%arg0: i32) -> (i32, i32) {
    %c0_i32 = arith.constant 0 : i32
    %c0_i32_0 = arith.constant 0 : i32
    return %arg0, %c0_i32 : i32, i32
  }
}

module attributes {stable_mosaic.version = 11 : i64} {
  func.func @_matmul_affine_relu_kernel(%arg0: i32, %arg1: memref<104x90xbf16, #tpu.memory_space<vmem>>, %arg2: memref<90x20xbf16, #tpu.memory_space<vmem>>, %arg3: memref<1x20xf32, #tpu.memory_space<vmem>>, %arg4: memref<1x20xf32, #tpu.memory_space<vmem>>, %arg5: memref<104x20xbf16, #tpu.memory_space<vmem>>) attributes {dimension_semantics = [#tpu.dimension_semantics<parallel>], iteration_bounds = array<i64: 1>, scalar_prefetch = 0 : i64, scratch_operands = 0 : i64, tpu.core_type = #tpu.core_type<tc>, window_params = [{transform_indices = @transform_0, window_bounds = array<i64: 104, 90>}, {pipeline_mode = #tpu.pipeline_mode<synchronous>, transform_indices = @transform_1, window_bounds = array<i64: 90, 20>}, {pipeline_mode = #tpu.pipeline_mode<synchronous>, transform_indices = @transform_2, window_bounds = array<i64: 1, 20>}, {pipeline_mode = #tpu.pipeline_mode<synchronous>, transform_indices = @transform_3, window_bounds = array<i64: 1, 20>}, {transform_indices = @transform_4, window_bounds = array<i64: 104, 20>}]} {
    %c0 = arith.constant 0 : index
    %c0_0 = arith.constant 0 : index
    %0 = vector.load %arg1[%c0, %c0_0] : memref<104x90xbf16, #tpu.memory_space<vmem>>, vector<104x90xbf16>
    %c0_1 = arith.constant 0 : index
    %c0_2 = arith.constant 0 : index
    %1 = vector.load %arg2[%c0_1, %c0_2] : memref<90x20xbf16, #tpu.memory_space<vmem>>, vector<90x20xbf16>
    %cst = arith.constant dense<0.000000e+00> : vector<104x20xf32>
    %2 = tpu.matmul %0, %1, %cst {dimension_numbers = #tpu.dot_dimension_numbers<[1], [0], [0], [1], [0, 0, 1, 1], [], []>} : vector<104x90xbf16>, vector<90x20xbf16>, vector<104x20xf32> -> vector<104x20xf32>
    %c0_3 = arith.constant 0 : index
    %c0_4 = arith.constant 0 : index
    %3 = vector.load %arg3[%c0_3, %c0_4] : memref<1x20xf32, #tpu.memory_space<vmem>>, vector<1x20xf32>
    %4 = vector.broadcast %3 : vector<1x20xf32> to vector<104x20xf32>
    %5 = arith.mulf %2, %4 : vector<104x20xf32>
    %c0_5 = arith.constant 0 : index
    %c0_6 = arith.constant 0 : index
    %6 = vector.load %arg4[%c0_5, %c0_6] : memref<1x20xf32, #tpu.memory_space<vmem>>, vector<1x20xf32>
    %7 = vector.broadcast %6 : vector<1x20xf32> to vector<104x20xf32>
    %8 = arith.addf %5, %7 : vector<104x20xf32>
    %cst_7 = arith.constant 0.000000e+00 : f32
    %9 = vector.broadcast %cst_7 : f32 to vector<104x20xf32>
    %10 = arith.maximumf %8, %9 : vector<104x20xf32>
    %11 = arith.truncf %10 : vector<104x20xf32> to vector<104x20xbf16>
    %c0_8 = arith.constant 0 : index
    %c0_9 = arith.constant 0 : index
    %12 = vector.load %arg5[%c0_8, %c0_9] : memref<104x20xbf16, #tpu.memory_space<vmem>>, vector<104x20xbf16>
    tpu.vector_store %arg5[%c0_8, %c0_9], %11 {strides = array<i32>} : memref<104x20xbf16, #tpu.memory_space<vmem>>, vector<104x20xbf16>,
    return
  }
  func.func @transform_0(%arg0: i32) -> (i32, i32) {
    %c0_i32 = arith.constant 0 : i32
    %c0_i32_0 = arith.constant 0 : i32
    return %arg0, %c0_i32 : i32, i32
  }
  func.func @transform_1(%arg0: i32) -> (i32, i32) {
    %c0_i32 = arith.constant 0 : i32
    %c0_i32_0 = arith.constant 0 : i32
    %c0_i32_1 = arith.constant 0 : i32
    return %c0_i32, %c0_i32_0 : i32, i32
  }
  func.func @transform_2(%arg0: i32) -> (i32, i32) {
    %c0_i32 = arith.constant 0 : i32
    %c0_i32_0 = arith.constant 0 : i32
    %c0_i32_1 = arith.constant 0 : i32
    return %c0_i32, %c0_i32_0 : i32, i32
  }
  func.func @transform_3(%arg0: i32) -> (i32, i32) {
    %c0_i32 = arith.constant 0 : i32
    %c0_i32_0 = arith.constant 0 : i32
    %c0_i32_1 = arith.constant 0 : i32
    return %c0_i32, %c0_i32_0 : i32, i32
  }
  func.func @transform_4(%arg0: i32) -> (i32, i32) {
    %c0_i32 = arith.constant 0 : i32
    %c0_i32_0 = arith.constant 0 : i32
    return %arg0, %c0_i32 : i32, i32
  }
}

module attributes {stable_mosaic.version = 11 : i64} {
  func.func @_matmul_affine_relu_kernel(%arg0: i32, %arg1: memref<32x180xbf16, #tpu.memory_space<vmem>>, %arg2: memref<180x40xbf16, #tpu.memory_space<vmem>>, %arg3: memref<1x40xf32, #tpu.memory_space<vmem>>, %arg4: memref<1x40xf32, #tpu.memory_space<vmem>>, %arg5: memref<32x40xbf16, #tpu.memory_space<vmem>>) attributes {dimension_semantics = [#tpu.dimension_semantics<parallel>], iteration_bounds = array<i64: 1>, scalar_prefetch = 0 : i64, scratch_operands = 0 : i64, tpu.core_type = #tpu.core_type<tc>, window_params = [{transform_indices = @transform_0, window_bounds = array<i64: 32, 180>}, {pipeline_mode = #tpu.pipeline_mode<synchronous>, transform_indices = @transform_1, window_bounds = array<i64: 180, 40>}, {pipeline_mode = #tpu.pipeline_mode<synchronous>, transform_indices = @transform_2, window_bounds = array<i64: 1, 40>}, {pipeline_mode = #tpu.pipeline_mode<synchronous>, transform_indices = @transform_3, window_bounds = array<i64: 1, 40>}, {transform_indices = @transform_4, window_bounds = array<i64: 32, 40>}]} {
    %c0 = arith.constant 0 : index
    %c0_0 = arith.constant 0 : index
    %0 = vector.load %arg1[%c0, %c0_0] : memref<32x180xbf16, #tpu.memory_space<vmem>>, vector<32x180xbf16>
    %c0_1 = arith.constant 0 : index
    %c0_2 = arith.constant 0 : index
    %1 = vector.load %arg2[%c0_1, %c0_2] : memref<180x40xbf16, #tpu.memory_space<vmem>>, vector<180x40xbf16>
    %cst = arith.constant dense<0.000000e+00> : vector<32x40xf32>
    %2 = tpu.matmul %0, %1, %cst {dimension_numbers = #tpu.dot_dimension_numbers<[1], [0], [0], [1], [0, 0, 1, 1], [], []>} : vector<32x180xbf16>, vector<180x40xbf16>, vector<32x40xf32> -> vector<32x40xf32>
    %c0_3 = arith.constant 0 : index
    %c0_4 = arith.constant 0 : index
    %3 = vector.load %arg3[%c0_3, %c0_4] : memref<1x40xf32, #tpu.memory_space<vmem>>, vector<1x40xf32>
    %4 = vector.broadcast %3 : vector<1x40xf32> to vector<32x40xf32>
    %5 = arith.mulf %2, %4 : vector<32x40xf32>
    %c0_5 = arith.constant 0 : index
    %c0_6 = arith.constant 0 : index
    %6 = vector.load %arg4[%c0_5, %c0_6] : memref<1x40xf32, #tpu.memory_space<vmem>>, vector<1x40xf32>
    %7 = vector.broadcast %6 : vector<1x40xf32> to vector<32x40xf32>
    %8 = arith.addf %5, %7 : vector<32x40xf32>
    %cst_7 = arith.constant 0.000000e+00 : f32
    %9 = vector.broadcast %cst_7 : f32 to vector<32x40xf32>
    %10 = arith.maximumf %8, %9 : vector<32x40xf32>
    %11 = arith.truncf %10 : vector<32x40xf32> to vector<32x40xbf16>
    %c0_8 = arith.constant 0 : index
    %c0_9 = arith.constant 0 : index
    %12 = vector.load %arg5[%c0_8, %c0_9] : memref<32x40xbf16, #tpu.memory_space<vmem>>, vector<32x40xbf16>
    tpu.vector_store %arg5[%c0_8, %c0_9], %11 {strides = array<i32>} : memref<32x40xbf16, #tpu.memory_space<vmem>>, vector<32x40xbf16>,
    return
  }
  func.func @transform_0(%arg0: i32) -> (i32, i32) {
    %c0_i32 = arith.constant 0 : i32
    %c0_i32_0 = arith.constant 0 : i32
    return %arg0, %c0_i32 : i32, i32
  }
  func.func @transform_1(%arg0: i32) -> (i32, i32) {
    %c0_i32 = arith.constant 0 : i32
    %c0_i32_0 = arith.constant 0 : i32
    %c0_i32_1 = arith.constant 0 : i32
    return %c0_i32, %c0_i32_0 : i32, i32
  }
  func.func @transform_2(%arg0: i32) -> (i32, i32) {
    %c0_i32 = arith.constant 0 : i32
    %c0_i32_0 = arith.constant 0 : i32
    %c0_i32_1 = arith.constant 0 : i32
    return %c0_i32, %c0_i32_0 : i32, i32
  }
  func.func @transform_3(%arg0: i32) -> (i32, i32) {
    %c0_i32 = arith.constant 0 : i32
    %c0_i32_0 = arith.constant 0 : i32
    %c0_i32_1 = arith.constant 0 : i32
    return %c0_i32, %c0_i32_0 : i32, i32
  }
  func.func @transform_4(%arg0: i32) -> (i32, i32) {
    %c0_i32 = arith.constant 0 : i32
    %c0_i32_0 = arith.constant 0 : i32
    return %arg0, %c0_i32 : i32, i32
  }
}

module attributes {stable_mosaic.version = 11 : i64} {
  func.func @_fc_stack_kernel(%arg0: i32, %arg1: memref<8x640xbf16, #tpu.memory_space<vmem>>, %arg2: memref<640x120xbf16, #tpu.memory_space<vmem>>, %arg3: memref<1x120xf32, #tpu.memory_space<vmem>>, %arg4: memref<1x120xf32, #tpu.memory_space<vmem>>, %arg5: memref<120x60xbf16, #tpu.memory_space<vmem>>, %arg6: memref<1x60xf32, #tpu.memory_space<vmem>>, %arg7: memref<1x60xf32, #tpu.memory_space<vmem>>, %arg8: memref<60x10xbf16, #tpu.memory_space<vmem>>, %arg9: memref<1x10xf32, #tpu.memory_space<vmem>>, %arg10: memref<8x10xf32, #tpu.memory_space<vmem>>) attributes {dimension_semantics = [#tpu.dimension_semantics<parallel>], iteration_bounds = array<i64: 1>, scalar_prefetch = 0 : i64, scratch_operands = 0 : i64, tpu.core_type = #tpu.core_type<tc>, window_params = [{transform_indices = @transform_0, window_bounds = array<i64: 8, 640>}, {pipeline_mode = #tpu.pipeline_mode<synchronous>, transform_indices = @transform_1, window_bounds = array<i64: 640, 120>}, {pipeline_mode = #tpu.pipeline_mode<synchronous>, transform_indices = @transform_2, window_bounds = array<i64: 1, 120>}, {pipeline_mode = #tpu.pipeline_mode<synchronous>, transform_indices = @transform_3, window_bounds = array<i64: 1, 120>}, {pipeline_mode = #tpu.pipeline_mode<synchronous>, transform_indices = @transform_4, window_bounds = array<i64: 120, 60>}, {pipeline_mode = #tpu.pipeline_mode<synchronous>, transform_indices = @transform_5, window_bounds = array<i64: 1, 60>}, {pipeline_mode = #tpu.pipeline_mode<synchronous>, transform_indices = @transform_6, window_bounds = array<i64: 1, 60>}, {pipeline_mode = #tpu.pipeline_mode<synchronous>, transform_indices = @transform_7, window_bounds = array<i64: 60, 10>}, {pipeline_mode = #tpu.pipeline_mode<synchronous>, transform_indices = @transform_8, window_bounds = array<i64: 1, 10>}, {transform_indices = @transform_9, window_bounds = array<i64: 8, 10>}]} {
    %c0 = arith.constant 0 : index
    %c0_0 = arith.constant 0 : index
    %0 = vector.load %arg2[%c0, %c0_0] : memref<640x120xbf16, #tpu.memory_space<vmem>>, vector<640x120xbf16>
    %c0_1 = arith.constant 0 : index
    %c0_2 = arith.constant 0 : index
    %1 = vector.load %arg5[%c0_1, %c0_2] : memref<120x60xbf16, #tpu.memory_space<vmem>>, vector<120x60xbf16>
    %c0_3 = arith.constant 0 : index
    %c0_4 = arith.constant 0 : index
    %2 = vector.load %arg8[%c0_3, %c0_4] : memref<60x10xbf16, #tpu.memory_space<vmem>>, vector<60x10xbf16>
    %c0_5 = arith.constant 0 : index
    %c0_6 = arith.constant 0 : index
    %3 = vector.load %arg1[%c0_5, %c0_6] : memref<8x640xbf16, #tpu.memory_space<vmem>>, vector<8x640xbf16>
    %cst = arith.constant dense<0.000000e+00> : vector<8x120xf32>
    %4 = tpu.matmul %3, %0, %cst {dimension_numbers = #tpu.dot_dimension_numbers<[1], [0], [0], [1], [0, 0, 1, 1], [], []>} : vector<8x640xbf16>, vector<640x120xbf16>, vector<8x120xf32> -> vector<8x120xf32>
    %c0_7 = arith.constant 0 : index
    %c0_8 = arith.constant 0 : index
    %5 = vector.load %arg3[%c0_7, %c0_8] : memref<1x120xf32, #tpu.memory_space<vmem>>, vector<1x120xf32>
    %6 = vector.broadcast %5 : vector<1x120xf32> to vector<8x120xf32>
    %7 = arith.mulf %4, %6 : vector<8x120xf32>
    %c0_9 = arith.constant 0 : index
    %c0_10 = arith.constant 0 : index
    %8 = vector.load %arg4[%c0_9, %c0_10] : memref<1x120xf32, #tpu.memory_space<vmem>>, vector<1x120xf32>
    %9 = vector.broadcast %8 : vector<1x120xf32> to vector<8x120xf32>
    %10 = arith.addf %7, %9 : vector<8x120xf32>
    %cst_11 = arith.constant 0.000000e+00 : f32
    %11 = vector.broadcast %cst_11 : f32 to vector<8x120xf32>
    %12 = arith.maximumf %10, %11 : vector<8x120xf32>
    %13 = arith.truncf %12 : vector<8x120xf32> to vector<8x120xbf16>
    %cst_12 = arith.constant dense<0.000000e+00> : vector<8x60xf32>
    %14 = tpu.matmul %13, %1, %cst_12 {dimension_numbers = #tpu.dot_dimension_numbers<[1], [0], [0], [1], [0, 0, 1, 1], [], []>} : vector<8x120xbf16>, vector<120x60xbf16>, vector<8x60xf32> -> vector<8x60xf32>
    %c0_13 = arith.constant 0 : index
    %c0_14 = arith.constant 0 : index
    %15 = vector.load %arg6[%c0_13, %c0_14] : memref<1x60xf32, #tpu.memory_space<vmem>>, vector<1x60xf32>
    %16 = vector.broadcast %15 : vector<1x60xf32> to vector<8x60xf32>
    %17 = arith.mulf %14, %16 : vector<8x60xf32>
    %c0_15 = arith.constant 0 : index
    %c0_16 = arith.constant 0 : index
    %18 = vector.load %arg7[%c0_15, %c0_16] : memref<1x60xf32, #tpu.memory_space<vmem>>, vector<1x60xf32>
    %19 = vector.broadcast %18 : vector<1x60xf32> to vector<8x60xf32>
    %20 = arith.addf %17, %19 : vector<8x60xf32>
    %cst_17 = arith.constant 0.000000e+00 : f32
    %21 = vector.broadcast %cst_17 : f32 to vector<8x60xf32>
    %22 = arith.maximumf %20, %21 : vector<8x60xf32>
    %23 = arith.truncf %22 : vector<8x60xf32> to vector<8x60xbf16>
    %cst_18 = arith.constant dense<0.000000e+00> : vector<8x10xf32>
    %24 = tpu.matmul %23, %2, %cst_18 {dimension_numbers = #tpu.dot_dimension_numbers<[1], [0], [0], [1], [0, 0, 1, 1], [], []>} : vector<8x60xbf16>, vector<60x10xbf16>, vector<8x10xf32> -> vector<8x10xf32>
    %c0_19 = arith.constant 0 : index
    %c0_20 = arith.constant 0 : index
    %25 = vector.load %arg9[%c0_19, %c0_20] : memref<1x10xf32, #tpu.memory_space<vmem>>, vector<1x10xf32>
    %26 = vector.broadcast %25 : vector<1x10xf32> to vector<8x10xf32>
    %27 = arith.addf %24, %26 : vector<8x10xf32>
    %cst_21 = arith.constant dense<0xFF800000> : vector<8xf32>
    %28 = vector.multi_reduction <maximumf>, %27, %cst_21 [1] : vector<8x10xf32> to vector<8xf32>
    %29 = vector.shape_cast %28 : vector<8xf32> to vector<8x1xf32>
    %30 = vector.broadcast %29 : vector<8x1xf32> to vector<8x10xf32>
    %31 = arith.subf %27, %30 : vector<8x10xf32>
    %32 = math.exp %31 : vector<8x10xf32>
    %cst_22 = arith.constant dense<0.000000e+00> : vector<8xf32>
    %33 = vector.multi_reduction <add>, %32, %cst_22 [1] : vector<8x10xf32> to vector<8xf32>
    %34 = vector.shape_cast %33 : vector<8xf32> to vector<8x1xf32>
    %35 = math.log %34 : vector<8x1xf32>
    %36 = arith.addf %35, %29 : vector<8x1xf32>
    %37 = vector.broadcast %36 : vector<8x1xf32> to vector<8x10xf32>
    %38 = arith.subf %27, %37 : vector<8x10xf32>
    %c0_23 = arith.constant 0 : index
    %c0_24 = arith.constant 0 : index
    %39 = vector.load %arg10[%c0_23, %c0_24] : memref<8x10xf32, #tpu.memory_space<vmem>>, vector<8x10xf32>
    tpu.vector_store %arg10[%c0_23, %c0_24], %38 {strides = array<i32>} : memref<8x10xf32, #tpu.memory_space<vmem>>, vector<8x10xf32>,
    return
  }
  func.func @transform_0(%arg0: i32) -> (i32, i32) {
    %c0_i32 = arith.constant 0 : i32
    %c0_i32_0 = arith.constant 0 : i32
    return %arg0, %c0_i32 : i32, i32
  }
  func.func @transform_1(%arg0: i32) -> (i32, i32) {
    %c0_i32 = arith.constant 0 : i32
    %c0_i32_0 = arith.constant 0 : i32
    %c0_i32_1 = arith.constant 0 : i32
    return %c0_i32, %c0_i32_0 : i32, i32
  }
  func.func @transform_2(%arg0: i32) -> (i32, i32) {
    %c0_i32 = arith.constant 0 : i32
    %c0_i32_0 = arith.constant 0 : i32
    %c0_i32_1 = arith.constant 0 : i32
    return %c0_i32, %c0_i32_0 : i32, i32
  }
  func.func @transform_3(%arg0: i32) -> (i32, i32) {
    %c0_i32 = arith.constant 0 : i32
    %c0_i32_0 = arith.constant 0 : i32
    %c0_i32_1 = arith.constant 0 : i32
    return %c0_i32, %c0_i32_0 : i32, i32
  }
  func.func @transform_4(%arg0: i32) -> (i32, i32) {
    %c0_i32 = arith.constant 0 : i32
    %c0_i32_0 = arith.constant 0 : i32
    %c0_i32_1 = arith.constant 0 : i32
    return %c0_i32, %c0_i32_0 : i32, i32
  }
  func.func @transform_5(%arg0: i32) -> (i32, i32) {
    %c0_i32 = arith.constant 0 : i32
    %c0_i32_0 = arith.constant 0 : i32
    %c0_i32_1 = arith.constant 0 : i32
    return %c0_i32, %c0_i32_0 : i32, i32
  }
  func.func @transform_6(%arg0: i32) -> (i32, i32) {
    %c0_i32 = arith.constant 0 : i32
    %c0_i32_0 = arith.constant 0 : i32
    %c0_i32_1 = arith.constant 0 : i32
    return %c0_i32, %c0_i32_0 : i32, i32
  }
  func.func @transform_7(%arg0: i32) -> (i32, i32) {
    %c0_i32 = arith.constant 0 : i32
    %c0_i32_0 = arith.constant 0 : i32
    %c0_i32_1 = arith.constant 0 : i32
    return %c0_i32, %c0_i32_0 : i32, i32
  }
  func.func @transform_8(%arg0: i32) -> (i32, i32) {
    %c0_i32 = arith.constant 0 : i32
    %c0_i32_0 = arith.constant 0 : i32
    %c0_i32_1 = arith.constant 0 : i32
    return %c0_i32, %c0_i32_0 : i32, i32
  }
  func.func @transform_9(%arg0: i32) -> (i32, i32) {
    %c0_i32 = arith.constant 0 : i32
    %c0_i32_0 = arith.constant 0 : i32
    return %arg0, %c0_i32 : i32, i32
  }
}

</mosaic_0001>

<bundles_post_ra>
// kernel: convnet2_forward.4
= control target key start
LH: loop header
LB: loop body
LE: loop exit
PB: predicated region body
PF: predicated region fallthrough
CT: control target
= control target key end

     0   :  { %vm273_vm0 = vcmask 1043456   ;;  %vm274_vm1 = vcmask 1044480   ;;  %v1234_v0 = vmov 0.0   ;;  %v1235_v2 = vmov 65535   ;;  %s1721_s1 = inlined_call_operand.vmem [shape: bf16[9,10], index: 1, kind: input, shape index: {}]   ;;  %s1722_s0 = inlined_call_operand.vmem [shape: bf16[392,9], index: 0, kind: input, shape index: {}]   ;;  %s1723_s2 = inlined_call_operand.vmem [shape: f32[1,10], index: 2, kind: input, shape index: {}]   ;;  %s1724_s3 = inlined_call_operand.vmem [shape: f32[1,10], index: 3, kind: input, shape index: {}]   ;;  %s1725_s4 = inlined_call_operand.vmem [shape: bf16[392,10], index: 4, kind: output, shape index: {}]  }
   0x1   :  { %1101 = vmatprep.subr.bf16.mxu0 %v1234_v0  ;;  %v1208_v1 = vld [vmem:[%s1721_s1] sm:$0x1f]   ;;  %1203 = vmatprep.subr.bf16.mxu1 %v1234_v0  ;;  %v275_v3 = vsel %vm273_vm0, 4294967295, %v1235_v2  ;;  %vm1236_vm2 = vmmov 0   ;;  %v1210_v7 = vld [vmem:[%s1722_s0 + $0x68] sm:$0xff]   ;;  %vm197_vm3 = vcmask 72704  }
   0x2   :  { %v276_v4 = vsel %vm274_vm1, %v275_v3, 0  ;;  %1103 = vmatprep.mubr.msk.bf16.mxu0 %vm1236_vm2, %v1234_v0  ;;  %v1209_v5 = vld [vmem:[%s1722_s0] sm:$0xff]   ;;  %1155 = vmatprep.mubr.msk.bf16.mxu1 %vm1236_vm2, %v1234_v0  ;;  %v1211_v8 = vld [vmem:[%s1722_s0 + $0x8] sm:$0xff]   ;;  %v1212_v9 = vld [vmem:[%s1722_s0 + $0x70] sm:$0xff]   ;;  %vm870_vm4 = vcmask 76800  }
   0x3   :  { %v278_v6 = vand.u32 %v1208_v1, %v276_v4  ;;  %v1213_v10 = vld [vmem:[%s1722_s0 + $0x10] sm:$0xff]   ;;  %v1214_v11 = vld [vmem:[%s1722_s0 + $0x78] sm:$0xff]   ;;  %v1216_v13 = vld [vmem:[%s1722_s0 + $0x80] sm:$0xff]  }
   0x4   :  { %v1215_v12 = vld [vmem:[%s1722_s0 + $0x18] sm:$0xff]   ;;  %v1217_v14 = vld [vmem:[%s1722_s0 + $0x20] sm:$0xff]   ;;  %v1218_v15 = vld [vmem:[%s1722_s0 + $0x88] sm:$0xff]  }
   0x5   :  { %1102 = vmatpush3.bf16.msra.mxu0 %v278_v6  ;;  %1204 = vmatpush3.bf16.msra.mxu1 %v278_v6  ;;  %v1219_v16 = vld [vmem:[%s1722_s0 + $0x28] sm:$0xff]   ;;  %v1220_v17 = vld [vmem:[%s1722_s0 + $0x90] sm:$0xff]   ;;  %v1222_v19 = vld [vmem:[%s1722_s0 + $0x98] sm:$0xff]  }
   0x6   :  { %v1221_v18 = vld [vmem:[%s1722_s0 + $0x30] sm:$0xff]   ;;  %v1223_v20 = vld [vmem:[%s1722_s0 + $0x38] sm:$0xff]   ;;  %v1224_v21 = vld [vmem:[%s1722_s0 + $0xa0] sm:$0xff]  }
   0x7   :  { %v1225_v22 = vld [vmem:[%s1722_s0 + $0x40] sm:$0xff]   ;;  %v1226_v23 = vld [vmem:[%s1722_s0 + $0xa8] sm:$0xff]   ;;  %v1228_v25 = vld [vmem:[%s1722_s0 + $0xb0] sm:$0xff]  }
   0x8   :  { %1104 = vmatmul.mubr.msk.bf16.vlgmr.msra.gmra.mxu0 %vm197_vm3, %v1209_v5  ;;  %1156 = vmatmul.mubr.msk.bf16.vlgmr.msra.gmra.mxu1 %vm197_vm3, %v1210_v7  ;;  %v1227_v24 = vld [vmem:[%s1722_s0 + $0x48] sm:$0xff]   ;;  %v1229_v26 = vld [vmem:[%s1722_s0 + $0x50] sm:$0xff]   ;;  %v1230_v27 = vld [vmem:[%s1722_s0 + $0xb8] sm:$0xff]  }
   0x9   :  { %1107 = vmatprep.mubr.msk.bf16.mxu0 %vm1236_vm2, %v1234_v0  ;;  %1159 = vmatprep.mubr.msk.bf16.mxu1 %vm1236_vm2, %v1234_v0  ;;  %v1231_v28 = vld [vmem:[%s1722_s0 + $0x58] sm:$0xff]   ;;  %v1232_v29 = vld [vmem:[%s1722_s0 + $0xc0] ss:$0 sps:$4 sm:$0xff]  }
   0xa   :  { %v1233_v30 = vld [vmem:[%s1722_s0 + $0x60] sm:$0xff]  }
   0xb   :  { %v1420_v31 = vld [vmem:[%s1723_s2] ss:$0 sm:$0xff] }
   0xc   :  { %v1425_v33 = vld [vmem:[%s1724_s3] ss:$0 sm:$0xff] }
  0x10   :  { %1108 = vmatmul.mubr.msk.bf16.gmra.mxu0 %vm197_vm3, %v1211_v8  ;;  %1160 = vmatmul.mubr.msk.bf16.gmra.mxu1 %vm197_vm3, %v1212_v9 }
  0x11   :  { %1111 = vmatprep.mubr.msk.bf16.mxu0 %vm1236_vm2, %v1234_v0  ;;  %1163 = vmatprep.mubr.msk.bf16.mxu1 %vm1236_vm2, %v1234_v0 }
  0x18   :  { %1112 = vmatmul.mubr.msk.bf16.gmra.mxu0 %vm197_vm3, %v1213_v10  ;;  %1164 = vmatmul.mubr.msk.bf16.gmra.mxu1 %vm197_vm3, %v1214_v11 }
  0x19   :  { %1115 = vmatprep.mubr.msk.bf16.mxu0 %vm1236_vm2, %v1234_v0  ;;  %1167 = vmatprep.mubr.msk.bf16.mxu1 %vm1236_vm2, %v1234_v0 }
  0x20   :  { %1116 = vmatmul.mubr.msk.bf16.gmra.mxu0 %vm197_vm3, %v1215_v12  ;;  %1168 = vmatmul.mubr.msk.bf16.gmra.mxu1 %vm197_vm3, %v1216_v13 }
  0x21   :  { %1119 = vmatprep.mubr.msk.bf16.mxu0 %vm1236_vm2, %v1234_v0  ;;  %1171 = vmatprep.mubr.msk.bf16.mxu1 %vm1236_vm2, %v1234_v0 }
  0x28   :  { %1120 = vmatmul.mubr.msk.bf16.gmra.mxu0 %vm197_vm3, %v1217_v14  ;;  %1172 = vmatmul.mubr.msk.bf16.gmra.mxu1 %vm197_vm3, %v1218_v15 }
  0x29   :  { %1123 = vmatprep.mubr.msk.bf16.mxu0 %vm1236_vm2, %v1234_v0  ;;  %1175 = vmatprep.mubr.msk.bf16.mxu1 %vm1236_vm2, %v1234_v0 }
  0x30   :  { %1124 = vmatmul.mubr.msk.bf16.gmra.mxu0 %vm197_vm3, %v1219_v16  ;;  %1176 = vmatmul.mubr.msk.bf16.gmra.mxu1 %vm197_vm3, %v1220_v17 }
  0x31   :  { %1127 = vmatprep.mubr.msk.bf16.mxu0 %vm1236_vm2, %v1234_v0  ;;  %1179 = vmatprep.mubr.msk.bf16.mxu1 %vm1236_vm2, %v1234_v0 }
  0x38   :  { %1128 = vmatmul.mubr.msk.bf16.gmra.mxu0 %vm197_vm3, %v1221_v18  ;;  %1180 = vmatmul.mubr.msk.bf16.gmra.mxu1 %vm197_vm3, %v1222_v19 }
  0x39   :  { %1131 = vmatprep.mubr.msk.bf16.mxu0 %vm1236_vm2, %v1234_v0  ;;  %1183 = vmatprep.mubr.msk.bf16.mxu1 %vm1236_vm2, %v1234_v0 }
  0x40   :  { %1132 = vmatmul.mubr.msk.bf16.gmra.mxu0 %vm197_vm3, %v1223_v20  ;;  %1184 = vmatmul.mubr.msk.bf16.gmra.mxu1 %vm197_vm3, %v1224_v21 }
  0x41   :  { %1135 = vmatprep.mubr.msk.bf16.mxu0 %vm1236_vm2, %v1234_v0  ;;  %1187 = vmatprep.mubr.msk.bf16.mxu1 %vm1236_vm2, %v1234_v0 }
  0x48   :  { %1136 = vmatmul.mubr.msk.bf16.gmra.mxu0 %vm197_vm3, %v1225_v22  ;;  %1188 = vmatmul.mubr.msk.bf16.gmra.mxu1 %vm197_vm3, %v1226_v23 }
  0x49   :  { %1139 = vmatprep.mubr.msk.bf16.mxu0 %vm1236_vm2, %v1234_v0  ;;  %1191 = vmatprep.mubr.msk.bf16.mxu1 %vm1236_vm2, %v1234_v0 }
  0x50   :  { %1140 = vmatmul.mubr.msk.bf16.gmra.mxu0 %vm197_vm3, %v1227_v24  ;;  %1192 = vmatmul.mubr.msk.bf16.gmra.mxu1 %vm197_vm3, %v1228_v25 }
  0x51   :  { %1143 = vmatprep.mubr.msk.bf16.mxu0 %vm1236_vm2, %v1234_v0  ;;  %1195 = vmatprep.mubr.msk.bf16.mxu1 %vm1236_vm2, %v1234_v0 }
  0x58   :  { %1144 = vmatmul.mubr.msk.bf16.gmra.mxu0 %vm197_vm3, %v1229_v26  ;;  %1196 = vmatmul.mubr.msk.bf16.gmra.mxu1 %vm197_vm3, %v1230_v27 }
  0x59   :  { %1147 = vmatprep.mubr.msk.bf16.mxu0 %vm1236_vm2, %v1234_v0  ;;  %1199 = vmatprep.mubr.msk.bf16.mxu1 %vm1236_vm2, %v1234_v0 }
  0x60   :  { %1148 = vmatmul.mubr.msk.bf16.gmra.mxu0 %vm197_vm3, %v1231_v28  ;;  %1200 = vmatmul.mubr.msk.bf16.gmra.mxu1 %vm197_vm3, %v1232_v29 }
  0x61   :  { %1151 = vmatprep.mubr.msk.bf16.mxu0 %vm1236_vm2, %v1234_v0 }
  0x68   :  { %1152 = vmatmul.mubr.msk.bf16.gmra.mxu0 %vm197_vm3, %v1233_v30 }
  0xc8   :  { %v314_v32 = vpop.f32.mrf.mxu0  ;;  %v418_v34 = vpop.f32.mrf.mxu1 }
  0xc9   :  { %v519_v35 = vmul.f32 %v1420_v31, %v314_v32  ;;  %v545_v36 = vmul.f32 %v1420_v31, %v418_v34 }
  0xca   :  { %v1105_v37 = vpop.f32.mrf.mxu0  ;;  %v1157_v38 = vpop.f32.mrf.mxu1 }
  0xcb   :  { %v575_v39 = vadd.f32 %v1425_v33, %v519_v35  ;;  %v601_v40 = vadd.f32 %v1425_v33, %v545_v36 }
  0xcc   :  { %v317_v41 = vpop.f32.mrf.mxu0  ;;  %v421_v42 = vpop.f32.mrf.mxu1 }
  0xcd   :  { %v624_v43 = vmax.f32 %v575_v39, 0.0  ;;  %v520_v44 = vmul.f32 %v1420_v31, %v317_v41  ;;  %v650_v45 = vmax.f32 %v601_v40, 0.0  ;;  %v546_v46 = vmul.f32 %v1420_v31, %v421_v42 }
  0xce   :  { %v1106_v47 = vpop.f32.mrf.mxu0  ;;  %v1158_v48 = vpop.f32.mrf.mxu1 }
  0xcf   :  { %v1026_v49 = vpack.c.bf16 %v624_v43, %v624_v43  ;;  %v576_v50 = vadd.f32 %v1425_v33, %v520_v44  ;;  %v1052_v51 = vpack.c.bf16 %v650_v45, %v650_v45  ;;  %v602_v52 = vadd.f32 %v1425_v33, %v546_v46 }
  0xd0   :  { %v322_v53 = vpop.f32.mrf.mxu0  ;;  %v426_v54 = vpop.f32.mrf.mxu1 }
  0xd1   :  { %871 = vst.msk [vmem:[%s1725_s4] sm:$0xf] %vm870_vm4, %v1026_v49  ;;  %v625_v55 = vmax.f32 %v576_v50, 0.0  ;;  %897 = vst.msk [vmem:[%s1725_s4 + $0x68] sm:$0xf] %vm870_vm4, %v1052_v51  ;;  %v521_v56 = vmul.f32 %v1420_v31, %v322_v53  ;;  %v651_v57 = vmax.f32 %v602_v52, 0.0  ;;  %v547_v58 = vmul.f32 %v1420_v31, %v426_v54 }
  0xd2   :  { %v1109_v59 = vpop.f32.mrf.mxu0  ;;  %v1161_v60 = vpop.f32.mrf.mxu1 }
  0xd3   :  { %v1027_v61 = vpack.c.bf16 %v625_v55, %v625_v55  ;;  %v577_v62 = vadd.f32 %v1425_v33, %v521_v56  ;;  %v1053_v63 = vpack.c.bf16 %v651_v57, %v651_v57  ;;  %v603_v0 = vadd.f32 %v1425_v33, %v547_v58 }
  0xd4   :  { %v325_v1 = vpop.f32.mrf.mxu0  ;;  %v429_v2 = vpop.f32.mrf.mxu1 }
  0xd5   :  { %872 = vst.msk [vmem:[%s1725_s4 + $0x4] sm:$0xf] %vm870_vm4, %v1027_v61  ;;  %v626_v3 = vmax.f32 %v577_v62, 0.0  ;;  %898 = vst.msk [vmem:[%s1725_s4 + $0x6c] sm:$0xf] %vm870_vm4, %v1053_v63  ;;  %v522_v4 = vmul.f32 %v1420_v31, %v325_v1  ;;  %v652_v5 = vmax.f32 %v603_v0, 0.0  ;;  %v548_v6 = vmul.f32 %v1420_v31, %v429_v2 }
  0xd6   :  { %v1110_v7 = vpop.f32.mrf.mxu0  ;;  %v1162_v8 = vpop.f32.mrf.mxu1 }
  0xd7   :  { %v1028_v9 = vpack.c.bf16 %v626_v3, %v626_v3  ;;  %v578_v10 = vadd.f32 %v1425_v33, %v522_v4  ;;  %v1054_v11 = vpack.c.bf16 %v652_v5, %v652_v5  ;;  %v604_v12 = vadd.f32 %v1425_v33, %v548_v6 }
  0xd8   :  { %v330_v13 = vpop.f32.mrf.mxu0  ;;  %v434_v14 = vpop.f32.mrf.mxu1 }
  0xd9   :  { %873 = vst.msk [vmem:[%s1725_s4 + $0x8] sm:$0xf] %vm870_vm4, %v1028_v9  ;;  %v627_v15 = vmax.f32 %v578_v10, 0.0  ;;  %899 = vst.msk [vmem:[%s1725_s4 + $0x70] sm:$0xf] %vm870_vm4, %v1054_v11  ;;  %v523_v16 = vmul.f32 %v1420_v31, %v330_v13  ;;  %v653_v17 = vmax.f32 %v604_v12, 0.0  ;;  %v549_v18 = vmul.f32 %v1420_v31, %v434_v14 }
  0xda   :  { %v1113_v19 = vpop.f32.mrf.mxu0  ;;  %v1165_v20 = vpop.f32.mrf.mxu1 }
  0xdb   :  { %v1029_v21 = vpack.c.bf16 %v627_v15, %v627_v15  ;;  %v579_v22 = vadd.f32 %v1425_v33, %v523_v16  ;;  %v1055_v23 = vpack.c.bf16 %v653_v17, %v653_v17  ;;  %v605_v24 = vadd.f32 %v1425_v33, %v549_v18 }
  0xdc   :  { %v333_v25 = vpop.f32.mrf.mxu0  ;;  %v437_v26 = vpop.f32.mrf.mxu1 }
  0xdd   :  { %874 = vst.msk [vmem:[%s1725_s4 + $0xc] sm:$0xf] %vm870_vm4, %v1029_v21  ;;  %v628_v27 = vmax.f32 %v579_v22, 0.0  ;;  %900 = vst.msk [vmem:[%s1725_s4 + $0x74] sm:$0xf] %vm870_vm4, %v1055_v23  ;;  %v524_v28 = vmul.f32 %v1420_v31, %v333_v25  ;;  %v654_v29 = vmax.f32 %v605_v24, 0.0  ;;  %v550_v30 = vmul.f32 %v1420_v31, %v437_v26 }
  0xde   :  { %v1114_v32 = vpop.f32.mrf.mxu0  ;;  %v1166_v34 = vpop.f32.mrf.mxu1 }
  0xdf   :  { %v1030_v35 = vpack.c.bf16 %v628_v27, %v628_v27  ;;  %v580_v36 = vadd.f32 %v1425_v33, %v524_v28  ;;  %v1056_v37 = vpack.c.bf16 %v654_v29, %v654_v29  ;;  %v606_v38 = vadd.f32 %v1425_v33, %v550_v30 }
  0xe0   :  { %v338_v39 = vpop.f32.mrf.mxu0  ;;  %v442_v40 = vpop.f32.mrf.mxu1 }
  0xe1   :  { %875 = vst.msk [vmem:[%s1725_s4 + $0x10] sm:$0xf] %vm870_vm4, %v1030_v35  ;;  %v629_v41 = vmax.f32 %v580_v36, 0.0  ;;  %901 = vst.msk [vmem:[%s1725_s4 + $0x78] sm:$0xf] %vm870_vm4, %v1056_v37  ;;  %v525_v42 = vmul.f32 %v1420_v31, %v338_v39  ;;  %v655_v43 = vmax.f32 %v606_v38, 0.0  ;;  %v551_v44 = vmul.f32 %v1420_v31, %v442_v40 }
  0xe2   :  { %v1117_v45 = vpop.f32.mrf.mxu0  ;;  %v1169_v46 = vpop.f32.mrf.mxu1 }
  0xe3   :  { %v1031_v47 = vpack.c.bf16 %v629_v41, %v629_v41  ;;  %v581_v48 = vadd.f32 %v1425_v33, %v525_v42  ;;  %v1057_v49 = vpack.c.bf16 %v655_v43, %v655_v43  ;;  %v607_v50 = vadd.f32 %v1425_v33, %v551_v44 }
  0xe4   :  { %v341_v51 = vpop.f32.mrf.mxu0  ;;  %v445_v52 = vpop.f32.mrf.mxu1 }
  0xe5   :  { %876 = vst.msk [vmem:[%s1725_s4 + $0x14] sm:$0xf] %vm870_vm4, %v1031_v47  ;;  %v630_v53 = vmax.f32 %v581_v48, 0.0  ;;  %902 = vst.msk [vmem:[%s1725_s4 + $0x7c] sm:$0xf] %vm870_vm4, %v1057_v49  ;;  %v526_v54 = vmul.f32 %v1420_v31, %v341_v51  ;;  %v656_v55 = vmax.f32 %v607_v50, 0.0  ;;  %v552_v56 = vmul.f32 %v1420_v31, %v445_v52 }
  0xe6   :  { %v1118_v57 = vpop.f32.mrf.mxu0  ;;  %v1170_v58 = vpop.f32.mrf.mxu1 }
  0xe7   :  { %v1032_v59 = vpack.c.bf16 %v630_v53, %v630_v53  ;;  %v582_v60 = vadd.f32 %v1425_v33, %v526_v54  ;;  %v1058_v61 = vpack.c.bf16 %v656_v55, %v656_v55  ;;  %v608_v62 = vadd.f32 %v1425_v33, %v552_v56 }
  0xe8   :  { %v346_v63 = vpop.f32.mrf.mxu0  ;;  %v450_v0 = vpop.f32.mrf.mxu1 }
  0xe9   :  { %877 = vst.msk [vmem:[%s1725_s4 + $0x18] sm:$0xf] %vm870_vm4, %v1032_v59  ;;  %v631_v1 = vmax.f32 %v582_v60, 0.0  ;;  %903 = vst.msk [vmem:[%s1725_s4 + $0x80] sm:$0xf] %vm870_vm4, %v1058_v61  ;;  %v527_v2 = vmul.f32 %v1420_v31, %v346_v63  ;;  %v657_v3 = vmax.f32 %v608_v62, 0.0  ;;  %v553_v4 = vmul.f32 %v1420_v31, %v450_v0 }
  0xea   :  { %v1121_v5 = vpop.f32.mrf.mxu0  ;;  %v1173_v6 = vpop.f32.mrf.mxu1 }
  0xeb   :  { %v1033_v7 = vpack.c.bf16 %v631_v1, %v631_v1  ;;  %v583_v8 = vadd.f32 %v1425_v33, %v527_v2  ;;  %v1059_v9 = vpack.c.bf16 %v657_v3, %v657_v3  ;;  %v609_v10 = vadd.f32 %v1425_v33, %v553_v4 }
  0xec   :  { %v349_v11 = vpop.f32.mrf.mxu0  ;;  %v453_v12 = vpop.f32.mrf.mxu1 }
  0xed   :  { %878 = vst.msk [vmem:[%s1725_s4 + $0x1c] sm:$0xf] %vm870_vm4, %v1033_v7  ;;  %v632_v13 = vmax.f32 %v583_v8, 0.0  ;;  %904 = vst.msk [vmem:[%s1725_s4 + $0x84] sm:$0xf] %vm870_vm4, %v1059_v9  ;;  %v528_v14 = vmul.f32 %v1420_v31, %v349_v11  ;;  %v658_v15 = vmax.f32 %v609_v10, 0.0  ;;  %v554_v16 = vmul.f32 %v1420_v31, %v453_v12 }
  0xee   :  { %v1122_v17 = vpop.f32.mrf.mxu0  ;;  %v1174_v18 = vpop.f32.mrf.mxu1 }
  0xef   :  { %v1034_v19 = vpack.c.bf16 %v632_v13, %v632_v13  ;;  %v584_v20 = vadd.f32 %v1425_v33, %v528_v14  ;;  %v1060_v21 = vpack.c.bf16 %v658_v15, %v658_v15  ;;  %v610_v22 = vadd.f32 %v1425_v33, %v554_v16 }
  0xf0   :  { %v354_v23 = vpop.f32.mrf.mxu0  ;;  %v458_v24 = vpop.f32.mrf.mxu1 }
  0xf1   :  { %879 = vst.msk [vmem:[%s1725_s4 + $0x20] sm:$0xf] %vm870_vm4, %v1034_v19  ;;  %v633_v25 = vmax.f32 %v584_v20, 0.0  ;;  %905 = vst.msk [vmem:[%s1725_s4 + $0x88] sm:$0xf] %vm870_vm4, %v1060_v21  ;;  %v529_v26 = vmul.f32 %v1420_v31, %v354_v23  ;;  %v659_v27 = vmax.f32 %v610_v22, 0.0  ;;  %v555_v28 = vmul.f32 %v1420_v31, %v458_v24 }
  0xf2   :  { %v1125_v29 = vpop.f32.mrf.mxu0  ;;  %v1177_v30 = vpop.f32.mrf.mxu1 }
  0xf3   :  { %v1035_v32 = vpack.c.bf16 %v633_v25, %v633_v25  ;;  %v585_v34 = vadd.f32 %v1425_v33, %v529_v26  ;;  %v1061_v35 = vpack.c.bf16 %v659_v27, %v659_v27  ;;  %v611_v36 = vadd.f32 %v1425_v33, %v555_v28 }
  0xf4   :  { %v357_v37 = vpop.f32.mrf.mxu0  ;;  %v461_v38 = vpop.f32.mrf.mxu1 }
  0xf5   :  { %880 = vst.msk [vmem:[%s1725_s4 + $0x24] sm:$0xf] %vm870_vm4, %v1035_v32  ;;  %v634_v39 = vmax.f32 %v585_v34, 0.0  ;;  %906 = vst.msk [vmem:[%s1725_s4 + $0x8c] sm:$0xf] %vm870_vm4, %v1061_v35  ;;  %v530_v40 = vmul.f32 %v1420_v31, %v357_v37  ;;  %v660_v41 = vmax.f32 %v611_v36, 0.0  ;;  %v556_v42 = vmul.f32 %v1420_v31, %v461_v38 }
  0xf6   :  { %v1126_v43 = vpop.f32.mrf.mxu0  ;;  %v1178_v44 = vpop.f32.mrf.mxu1 }
  0xf7   :  { %v1036_v45 = vpack.c.bf16 %v634_v39, %v634_v39  ;;  %v586_v46 = vadd.f32 %v1425_v33, %v530_v40  ;;  %v1062_v47 = vpack.c.bf16 %v660_v41, %v660_v41  ;;  %v612_v48 = vadd.f32 %v1425_v33, %v556_v42 }
  0xf8   :  { %v362_v49 = vpop.f32.mrf.mxu0  ;;  %v466_v50 = vpop.f32.mrf.mxu1 }
  0xf9   :  { %881 = vst.msk [vmem:[%s1725_s4 + $0x28] sm:$0xf] %vm870_vm4, %v1036_v45  ;;  %v635_v51 = vmax.f32 %v586_v46, 0.0  ;;  %907 = vst.msk [vmem:[%s1725_s4 + $0x90] sm:$0xf] %vm870_vm4, %v1062_v47  ;;  %v531_v52 = vmul.f32 %v1420_v31, %v362_v49  ;;  %v661_v53 = vmax.f32 %v612_v48, 0.0  ;;  %v557_v54 = vmul.f32 %v1420_v31, %v466_v50 }
  0xfa   :  { %v1129_v55 = vpop.f32.mrf.mxu0  ;;  %v1181_v56 = vpop.f32.mrf.mxu1 }
  0xfb   :  { %v1037_v57 = vpack.c.bf16 %v635_v51, %v635_v51  ;;  %v587_v58 = vadd.f32 %v1425_v33, %v531_v52  ;;  %v1063_v59 = vpack.c.bf16 %v661_v53, %v661_v53  ;;  %v613_v60 = vadd.f32 %v1425_v33, %v557_v54 }
  0xfc   :  { %v365_v61 = vpop.f32.mrf.mxu0  ;;  %v469_v62 = vpop.f32.mrf.mxu1 }
  0xfd   :  { %882 = vst.msk [vmem:[%s1725_s4 + $0x2c] sm:$0xf] %vm870_vm4, %v1037_v57  ;;  %v636_v63 = vmax.f32 %v587_v58, 0.0  ;;  %908 = vst.msk [vmem:[%s1725_s4 + $0x94] sm:$0xf] %vm870_vm4, %v1063_v59  ;;  %v532_v0 = vmul.f32 %v1420_v31, %v365_v61  ;;  %v662_v1 = vmax.f32 %v613_v60, 0.0  ;;  %v558_v2 = vmul.f32 %v1420_v31, %v469_v62 }
  0xfe   :  { %v1130_v3 = vpop.f32.mrf.mxu0  ;;  %v1182_v4 = vpop.f32.mrf.mxu1 }
  0xff   :  { %v1038_v5 = vpack.c.bf16 %v636_v63, %v636_v63  ;;  %v588_v6 = vadd.f32 %v1425_v33, %v532_v0  ;;  %v1064_v7 = vpack.c.bf16 %v662_v1, %v662_v1  ;;  %v614_v8 = vadd.f32 %v1425_v33, %v558_v2 }
 0x100   :  { %v370_v9 = vpop.f32.mrf.mxu0  ;;  %v474_v10 = vpop.f32.mrf.mxu1 }
 0x101   :  { %883 = vst.msk [vmem:[%s1725_s4 + $0x30] sm:$0xf] %vm870_vm4, %v1038_v5  ;;  %v637_v11 = vmax.f32 %v588_v6, 0.0  ;;  %909 = vst.msk [vmem:[%s1725_s4 + $0x98] sm:$0xf] %vm870_vm4, %v1064_v7  ;;  %v533_v12 = vmul.f32 %v1420_v31, %v370_v9  ;;  %v663_v13 = vmax.f32 %v614_v8, 0.0  ;;  %v559_v14 = vmul.f32 %v1420_v31, %v474_v10 }
 0x102   :  { %v1133_v15 = vpop.f32.mrf.mxu0  ;;  %v1185_v16 = vpop.f32.mrf.mxu1 }
 0x103   :  { %v1039_v17 = vpack.c.bf16 %v637_v11, %v637_v11  ;;  %v589_v18 = vadd.f32 %v1425_v33, %v533_v12  ;;  %v1065_v19 = vpack.c.bf16 %v663_v13, %v663_v13  ;;  %v615_v20 = vadd.f32 %v1425_v33, %v559_v14 }
 0x104   :  { %v373_v21 = vpop.f32.mrf.mxu0  ;;  %v477_v22 = vpop.f32.mrf.mxu1 }
 0x105   :  { %884 = vst.msk [vmem:[%s1725_s4 + $0x34] sm:$0xf] %vm870_vm4, %v1039_v17  ;;  %v638_v23 = vmax.f32 %v589_v18, 0.0  ;;  %910 = vst.msk [vmem:[%s1725_s4 + $0x9c] sm:$0xf] %vm870_vm4, %v1065_v19  ;;  %v534_v24 = vmul.f32 %v1420_v31, %v373_v21  ;;  %v664_v25 = vmax.f32 %v615_v20, 0.0  ;;  %v560_v26 = vmul.f32 %v1420_v31, %v477_v22 }
 0x106   :  { %v1134_v27 = vpop.f32.mrf.mxu0  ;;  %v1186_v28 = vpop.f32.mrf.mxu1 }
 0x107   :  { %v1040_v29 = vpack.c.bf16 %v638_v23, %v638_v23  ;;  %v590_v30 = vadd.f32 %v1425_v33, %v534_v24  ;;  %v1066_v32 = vpack.c.bf16 %v664_v25, %v664_v25  ;;  %v616_v34 = vadd.f32 %v1425_v33, %v560_v26 }
 0x108   :  { %v378_v35 = vpop.f32.mrf.mxu0  ;;  %v482_v36 = vpop.f32.mrf.mxu1 }
 0x109   :  { %885 = vst.msk [vmem:[%s1725_s4 + $0x38] sm:$0xf] %vm870_vm4, %v1040_v29  ;;  %v639_v37 = vmax.f32 %v590_v30, 0.0  ;;  %911 = vst.msk [vmem:[%s1725_s4 + $0xa0] sm:$0xf] %vm870_vm4, %v1066_v32  ;;  %v535_v38 = vmul.f32 %v1420_v31, %v378_v35  ;;  %v665_v39 = vmax.f32 %v616_v34, 0.0  ;;  %v561_v40 = vmul.f32 %v1420_v31, %v482_v36 }
 0x10a   :  { %v1137_v41 = vpop.f32.mrf.mxu0  ;;  %v1189_v42 = vpop.f32.mrf.mxu1 }
 0x10b   :  { %v1041_v43 = vpack.c.bf16 %v639_v37, %v639_v37  ;;  %v591_v44 = vadd.f32 %v1425_v33, %v535_v38  ;;  %v1067_v45 = vpack.c.bf16 %v665_v39, %v665_v39  ;;  %v617_v46 = vadd.f32 %v1425_v33, %v561_v40 }
 0x10c   :  { %v381_v47 = vpop.f32.mrf.mxu0  ;;  %v485_v48 = vpop.f32.mrf.mxu1 }
 0x10d   :  { %886 = vst.msk [vmem:[%s1725_s4 + $0x3c] sm:$0xf] %vm870_vm4, %v1041_v43  ;;  %v640_v49 = vmax.f32 %v591_v44, 0.0  ;;  %912 = vst.msk [vmem:[%s1725_s4 + $0xa4] sm:$0xf] %vm870_vm4, %v1067_v45  ;;  %v536_v50 = vmul.f32 %v1420_v31, %v381_v47  ;;  %v666_v51 = vmax.f32 %v617_v46, 0.0  ;;  %v562_v52 = vmul.f32 %v1420_v31, %v485_v48 }
 0x10e   :  { %v1138_v53 = vpop.f32.mrf.mxu0  ;;  %v1190_v54 = vpop.f32.mrf.mxu1 }
 0x10f   :  { %v1042_v55 = vpack.c.bf16 %v640_v49, %v640_v49  ;;  %v592_v56 = vadd.f32 %v1425_v33, %v536_v50  ;;  %v1068_v57 = vpack.c.bf16 %v666_v51, %v666_v51  ;;  %v618_v58 = vadd.f32 %v1425_v33, %v562_v52 }
 0x110   :  { %v386_v59 = vpop.f32.mrf.mxu0  ;;  %v490_v60 = vpop.f32.mrf.mxu1 }
 0x111   :  { %887 = vst.msk [vmem:[%s1725_s4 + $0x40] sm:$0xf] %vm870_vm4, %v1042_v55  ;;  %v641_v61 = vmax.f32 %v592_v56, 0.0  ;;  %913 = vst.msk [vmem:[%s1725_s4 + $0xa8] sm:$0xf] %vm870_vm4, %v1068_v57  ;;  %v537_v62 = vmul.f32 %v1420_v31, %v386_v59  ;;  %v667_v63 = vmax.f32 %v618_v58, 0.0  ;;  %v563_v0 = vmul.f32 %v1420_v31, %v490_v60 }
 0x112   :  { %v1141_v1 = vpop.f32.mrf.mxu0  ;;  %v1193_v2 = vpop.f32.mrf.mxu1 }
 0x113   :  { %v1043_v3 = vpack.c.bf16 %v641_v61, %v641_v61  ;;  %v593_v4 = vadd.f32 %v1425_v33, %v537_v62  ;;  %v1069_v5 = vpack.c.bf16 %v667_v63, %v667_v63  ;;  %v619_v6 = vadd.f32 %v1425_v33, %v563_v0 }
 0x114   :  { %v389_v7 = vpop.f32.mrf.mxu0  ;;  %v493_v8 = vpop.f32.mrf.mxu1 }
 0x115   :  { %888 = vst.msk [vmem:[%s1725_s4 + $0x44] sm:$0xf] %vm870_vm4, %v1043_v3  ;;  %v642_v9 = vmax.f32 %v593_v4, 0.0  ;;  %914 = vst.msk [vmem:[%s1725_s4 + $0xac] sm:$0xf] %vm870_vm4, %v1069_v5  ;;  %v538_v10 = vmul.f32 %v1420_v31, %v389_v7  ;;  %v668_v11 = vmax.f32 %v619_v6, 0.0  ;;  %v564_v12 = vmul.f32 %v1420_v31, %v493_v8 }
 0x116   :  { %v1142_v13 = vpop.f32.mrf.mxu0  ;;  %v1194_v14 = vpop.f32.mrf.mxu1 }
 0x117   :  { %v1044_v15 = vpack.c.bf16 %v642_v9, %v642_v9  ;;  %v594_v16 = vadd.f32 %v1425_v33, %v538_v10  ;;  %v1070_v17 = vpack.c.bf16 %v668_v11, %v668_v11  ;;  %v620_v18 = vadd.f32 %v1425_v33, %v564_v12 }
 0x118   :  { %v394_v19 = vpop.f32.mrf.mxu0  ;;  %v498_v20 = vpop.f32.mrf.mxu1 }
 0x119   :  { %889 = vst.msk [vmem:[%s1725_s4 + $0x48] sm:$0xf] %vm870_vm4, %v1044_v15  ;;  %v643_v21 = vmax.f32 %v594_v16, 0.0  ;;  %915 = vst.msk [vmem:[%s1725_s4 + $0xb0] sm:$0xf] %vm870_vm4, %v1070_v17  ;;  %v539_v22 = vmul.f32 %v1420_v31, %v394_v19  ;;  %v669_v23 = vmax.f32 %v620_v18, 0.0  ;;  %v565_v24 = vmul.f32 %v1420_v31, %v498_v20 }
 0x11a   :  { %v1145_v25 = vpop.f32.mrf.mxu0  ;;  %v1197_v26 = vpop.f32.mrf.mxu1 }
 0x11b   :  { %v1045_v27 = vpack.c.bf16 %v643_v21, %v643_v21  ;;  %v595_v28 = vadd.f32 %v1425_v33, %v539_v22  ;;  %v1071_v29 = vpack.c.bf16 %v669_v23, %v669_v23  ;;  %v621_v30 = vadd.f32 %v1425_v33, %v565_v24 }
 0x11c   :  { %v397_v32 = vpop.f32.mrf.mxu0  ;;  %v501_v34 = vpop.f32.mrf.mxu1 }
 0x11d   :  { %890 = vst.msk [vmem:[%s1725_s4 + $0x4c] sm:$0xf] %vm870_vm4, %v1045_v27  ;;  %v644_v35 = vmax.f32 %v595_v28, 0.0  ;;  %916 = vst.msk [vmem:[%s1725_s4 + $0xb4] sm:$0xf] %vm870_vm4, %v1071_v29  ;;  %v540_v36 = vmul.f32 %v1420_v31, %v397_v32  ;;  %v670_v37 = vmax.f32 %v621_v30, 0.0  ;;  %v566_v38 = vmul.f32 %v1420_v31, %v501_v34 }
 0x11e   :  { %v1146_v39 = vpop.f32.mrf.mxu0  ;;  %v1198_v40 = vpop.f32.mrf.mxu1 }
 0x11f   :  { %v1046_v41 = vpack.c.bf16 %v644_v35, %v644_v35  ;;  %v596_v42 = vadd.f32 %v1425_v33, %v540_v36  ;;  %v1072_v43 = vpack.c.bf16 %v670_v37, %v670_v37  ;;  %v622_v44 = vadd.f32 %v1425_v33, %v566_v38 }
 0x120   :  { %v402_v45 = vpop.f32.mrf.mxu0  ;;  %v506_v46 = vpop.f32.mrf.mxu1 }
 0x121   :  { %891 = vst.msk [vmem:[%s1725_s4 + $0x50] sm:$0xf] %vm870_vm4, %v1046_v41  ;;  %v645_v47 = vmax.f32 %v596_v42, 0.0  ;;  %917 = vst.msk [vmem:[%s1725_s4 + $0xb8] sm:$0xf] %vm870_vm4, %v1072_v43  ;;  %v541_v48 = vmul.f32 %v1420_v31, %v402_v45  ;;  %v671_v49 = vmax.f32 %v622_v44, 0.0  ;;  %v567_v50 = vmul.f32 %v1420_v31, %v506_v46 }
 0x122   :  { %v1149_v51 = vpop.f32.mrf.mxu0  ;;  %v1201_v52 = vpop.f32.mrf.mxu1 }
 0x123   :  { %v1047_v53 = vpack.c.bf16 %v645_v47, %v645_v47  ;;  %v597_v54 = vadd.f32 %v1425_v33, %v541_v48  ;;  %v1073_v55 = vpack.c.bf16 %v671_v49, %v671_v49  ;;  %v623_v56 = vadd.f32 %v1425_v33, %v567_v50 }
 0x124   :  { %v405_v57 = vpop.f32.mrf.mxu0  ;;  %v509_v58 = vpop.f32.mrf.mxu1 }
 0x125   :  { %892 = vst.msk [vmem:[%s1725_s4 + $0x54] sm:$0xf] %vm870_vm4, %v1047_v53  ;;  %v646_v59 = vmax.f32 %v597_v54, 0.0  ;;  %918 = vst.msk [vmem:[%s1725_s4 + $0xbc] sm:$0xf] %vm870_vm4, %v1073_v55  ;;  %v542_v60 = vmul.f32 %v1420_v31, %v405_v57  ;;  %v672_v61 = vmax.f32 %v623_v56, 0.0 }
 0x126   :  { %v1150_v62 = vpop.f32.mrf.mxu0  ;;  %v1202_v63 = vpop.f32.mrf.mxu1 }
 0x127   :  { %v1048_v0 = vpack.c.bf16 %v646_v59, %v646_v59  ;;  %v598_v1 = vadd.f32 %v1425_v33, %v542_v60  ;;  %v1074_v2 = vpack.c.bf16 %v672_v61, %v672_v61 }
 0x128   :  { %v410_v3 = vpop.f32.mrf.mxu0 }
 0x129   :  { %893 = vst.msk [vmem:[%s1725_s4 + $0x58] sm:$0xf] %vm870_vm4, %v1048_v0  ;;  %v647_v4 = vmax.f32 %v598_v1, 0.0  ;;  %919 = vst.msk [vmem:[%s1725_s4 + $0xc0] sm:$0xf] %vm870_vm4, %v1074_v2  ;;  %v543_v5 = vmul.f32 %v1420_v31, %v410_v3 }
 0x12a   :  { %v1153_v6 = vpop.f32.mrf.mxu0 }
 0x12b   :  { %v1049_v7 = vpack.c.bf16 %v647_v4, %v647_v4  ;;  %v599_v8 = vadd.f32 %v1425_v33, %v543_v5 }
 0x12c   :  { %v413_v9 = vpop.f32.mrf.mxu0 }
 0x12d   :  { %894 = vst.msk [vmem:[%s1725_s4 + $0x5c] sm:$0xf] %vm870_vm4, %v1049_v7  ;;  %v648_v10 = vmax.f32 %v599_v8, 0.0  ;;  %v544_v11 = vmul.f32 %v1420_v31, %v413_v9 }
 0x12e   :  { %v1154_v12 = vpop.f32.mrf.mxu0 }
 0x12f   :  { %v1050_v13 = vpack.c.bf16 %v648_v10, %v648_v10  ;;  %v600_v14 = vadd.f32 %v1425_v33, %v544_v11 }
 0x131   :  { %895 = vst.msk [vmem:[%s1725_s4 + $0x60] sm:$0xf] %vm870_vm4, %v1050_v13  ;;  %v649_v15 = vmax.f32 %v600_v14, 0.0 }
 0x133   :  { %v1051_v16 = vpack.c.bf16 %v649_v15, %v649_v15 }
 0x135   :  { %896 = vst.msk [vmem:[%s1725_s4 + $0x64] sm:$0xf] %vm870_vm4, %v1051_v16 }

// kernel: convnet2_forward.5
= control target key start
LH: loop header
LB: loop body
LE: loop exit
PB: predicated region body
PF: predicated region fallthrough
CT: control target
= control target key end

     0   :  { %vm133_vm0 = vcmask 1044480   ;;  %v477_v0 = vmov 0.0   ;;  %vm478_vm1 = vmmov 0   ;;  %vm111_vm2 = vcmask 736256   ;;  %s645_s1 = inlined_call_operand.vmem [shape: bf16[90,20], index: 1, kind: input, shape index: {}]   ;;  %s646_s0 = inlined_call_operand.vmem [shape: bf16[104,90], index: 0, kind: input, shape index: {}]   ;;  %s647_s2 = inlined_call_operand.vmem [shape: f32[1,20], index: 2, kind: input, shape index: {}]   ;;  %s648_s3 = inlined_call_operand.vmem [shape: f32[1,20], index: 3, kind: input, shape index: {}]   ;;  %s649_s4 = inlined_call_operand.vmem [shape: bf16[104,20], index: 4, kind: output, shape index: {}]  }
   0x1   :  { %410 = vmatprep.subr.bf16.mxu0 %v477_v0  ;;  %v464_v1 = vld [vmem:[%s645_s1 + $0x28] sm:$0x1f]   ;;  %450 = vmatprep.subr.bf16.mxu1 %v477_v0  ;;  %v465_v3 = vld [vmem:[%s645_s1 + $0x20] sm:$0xff]   ;;  %v466_v4 = vld [vmem:[%s645_s1 + $0x18] sm:$0xff]   ;;  %vm331_vm3 = vcmask 158720  }
   0x2   :  { %422 = vmatprep.mubr.msk.bf16.mxu0 %vm478_vm1, %v477_v0  ;;  %438 = vmatprep.mubr.msk.bf16.mxu1 %vm478_vm1, %v477_v0  ;;  %v135_v2 = vsel %vm133_vm0, %v464_v1, 0  ;;  %v467_v5 = vld [vmem:[%s645_s1 + $0x10] sm:$0xff]   ;;  %v468_v6 = vld [vmem:[%s645_s1 + $0x8] sm:$0xff]   ;;  %v469_v7 = vld [vmem:[%s645_s1] sm:$0xff]  }
   0x3   :  { %411 = vmatpush3.bf16.msra.mxu0 %v135_v2  ;;  %456 = vmatpush3.bf16.msra.mxu1 %v135_v2  ;;  %v470_v8 = vld [vmem:[%s646_s0] sm:$0xff]   ;;  %v472_v10 = vld [vmem:[%s646_s0 + $0x8] sm:$0xff]   ;;  %v474_v12 = vld [vmem:[%s646_s0 + $0x10] sm:$0xff]  }
   0x4   :  { %412 = vmatprep.subr.bf16.mxu0 %v477_v0  ;;  %451 = vmatprep.subr.bf16.mxu1 %v477_v0  ;;  %v471_v9 = vld [vmem:[%s646_s0 + $0x20] sm:$0xff]   ;;  %v473_v11 = vld [vmem:[%s646_s0 + $0x28] sm:$0xff]   ;;  %v475_v13 = vld [vmem:[%s646_s0 + $0x30] ss:$0 sps:$4 sm:$0xff]  }
   0x5   :  { %v476_v14 = vld [vmem:[%s646_s0 + $0x18] sm:$0xff]   ;;  %v560_v15 = vld [vmem:[%s647_s2] ss:$0 sm:$0xff] }
   0x6   :  { %v565_v17 = vld [vmem:[%s648_s3] ss:$0 sm:$0xff] }
   0x7   :  { %413 = vmatpush3.bf16.msra.mxu0 %v465_v3  ;;  %457 = vmatpush3.bf16.msra.mxu1 %v465_v3 }
   0x8   :  { %414 = vmatprep.subr.bf16.mxu0 %v477_v0  ;;  %452 = vmatprep.subr.bf16.mxu1 %v477_v0 }
   0xb   :  { %415 = vmatpush3.bf16.msra.mxu0 %v466_v4  ;;  %458 = vmatpush3.bf16.msra.mxu1 %v466_v4 }
   0xc   :  { %416 = vmatprep.subr.bf16.mxu0 %v477_v0  ;;  %453 = vmatprep.subr.bf16.mxu1 %v477_v0 }
   0xf   :  { %417 = vmatpush3.bf16.msra.mxu0 %v467_v5  ;;  %459 = vmatpush3.bf16.msra.mxu1 %v467_v5 }
  0x10   :  { %418 = vmatprep.subr.bf16.mxu0 %v477_v0  ;;  %454 = vmatprep.subr.bf16.mxu1 %v477_v0 }
  0x13   :  { %419 = vmatpush3.bf16.msra.mxu0 %v468_v6  ;;  %460 = vmatpush3.bf16.msra.mxu1 %v468_v6 }
  0x14   :  { %420 = vmatprep.subr.bf16.mxu0 %v477_v0  ;;  %455 = vmatprep.subr.bf16.mxu1 %v477_v0 }
  0x17   :  { %421 = vmatpush3.bf16.msra.mxu0 %v469_v7  ;;  %461 = vmatpush3.bf16.msra.mxu1 %v469_v7 }
  0x1a   :  { %423 = vmatmul.mubr.msk.bf16.vlgmr.msra.gmra.mxu0 %vm111_vm2, %v470_v8  ;;  %439 = vmatmul.mubr.msk.bf16.vlgmr.msra.gmra.mxu1 %vm111_vm2, %v471_v9 }
  0x1b   :  { %426 = vmatprep.mubr.msk.bf16.mxu0 %vm478_vm1, %v477_v0  ;;  %442 = vmatprep.mubr.msk.bf16.mxu1 %vm478_vm1, %v477_v0 }
  0x22   :  { %427 = vmatmul.mubr.msk.bf16.gmra.mxu0 %vm111_vm2, %v472_v10  ;;  %443 = vmatmul.mubr.msk.bf16.gmra.mxu1 %vm111_vm2, %v473_v11 }
  0x23   :  { %430 = vmatprep.mubr.msk.bf16.mxu0 %vm478_vm1, %v477_v0  ;;  %446 = vmatprep.mubr.msk.bf16.mxu1 %vm478_vm1, %v477_v0 }
  0x2a   :  { %431 = vmatmul.mubr.msk.bf16.gmra.mxu0 %vm111_vm2, %v474_v12  ;;  %447 = vmatmul.mubr.msk.bf16.gmra.mxu1 %vm111_vm2, %v475_v13 }
  0x2b   :  { %434 = vmatprep.mubr.msk.bf16.mxu0 %vm478_vm1, %v477_v0 }
  0x32   :  { %435 = vmatmul.mubr.msk.bf16.gmra.mxu0 %vm111_vm2, %v476_v14 }
  0xda   :  { %v171_v16 = vpop.f32.mrf.mxu0  ;;  %v203_v18 = vpop.f32.mrf.mxu1 }
  0xdb   :  { %v232_v19 = vmul.f32 %v560_v15, %v171_v16  ;;  %v240_v20 = vmul.f32 %v560_v15, %v203_v18 }
  0xdc   :  { %v424_v21 = vpop.f32.mrf.mxu0  ;;  %v440_v22 = vpop.f32.mrf.mxu1 }
  0xdd   :  { %v252_v23 = vadd.f32 %v565_v17, %v232_v19  ;;  %v260_v24 = vadd.f32 %v565_v17, %v240_v20 }
  0xde   :  { %v174_v25 = vpop.f32.mrf.mxu0  ;;  %v206_v26 = vpop.f32.mrf.mxu1 }
  0xdf   :  { %v265_v27 = vmax.f32 %v252_v23, 0.0  ;;  %v233_v28 = vmul.f32 %v560_v15, %v174_v25  ;;  %v273_v29 = vmax.f32 %v260_v24, 0.0  ;;  %v241_v30 = vmul.f32 %v560_v15, %v206_v26 }
  0xe0   :  { %v425_v31 = vpop.f32.mrf.mxu0  ;;  %v441_v32 = vpop.f32.mrf.mxu1 }
  0xe1   :  { %v384_v33 = vpack.c.bf16 %v265_v27, %v265_v27  ;;  %v253_v34 = vadd.f32 %v565_v17, %v233_v28  ;;  %v392_v35 = vpack.c.bf16 %v273_v29, %v273_v29  ;;  %v261_v36 = vadd.f32 %v565_v17, %v241_v30 }
  0xe2   :  { %v179_v37 = vpop.f32.mrf.mxu0  ;;  %v211_v38 = vpop.f32.mrf.mxu1 }
  0xe3   :  { %332 = vst.msk [vmem:[%s649_s4] sm:$0xf] %vm331_vm3, %v384_v33  ;;  %v266_v39 = vmax.f32 %v253_v34, 0.0  ;;  %340 = vst.msk [vmem:[%s649_s4 + $0x20] sm:$0xf] %vm331_vm3, %v392_v35  ;;  %v234_v40 = vmul.f32 %v560_v15, %v179_v37  ;;  %v274_v41 = vmax.f32 %v261_v36, 0.0  ;;  %v242_v42 = vmul.f32 %v560_v15, %v211_v38 }
  0xe4   :  { %v428_v43 = vpop.f32.mrf.mxu0  ;;  %v444_v44 = vpop.f32.mrf.mxu1 }
  0xe5   :  { %v385_v45 = vpack.c.bf16 %v266_v39, %v266_v39  ;;  %v254_v46 = vadd.f32 %v565_v17, %v234_v40  ;;  %v393_v47 = vpack.c.bf16 %v274_v41, %v274_v41  ;;  %v262_v48 = vadd.f32 %v565_v17, %v242_v42 }
  0xe6   :  { %v182_v49 = vpop.f32.mrf.mxu0  ;;  %v214_v50 = vpop.f32.mrf.mxu1 }
  0xe7   :  { %333 = vst.msk [vmem:[%s649_s4 + $0x4] sm:$0xf] %vm331_vm3, %v385_v45  ;;  %v267_v51 = vmax.f32 %v254_v46, 0.0  ;;  %341 = vst.msk [vmem:[%s649_s4 + $0x24] sm:$0xf] %vm331_vm3, %v393_v47  ;;  %v235_v52 = vmul.f32 %v560_v15, %v182_v49  ;;  %v275_v53 = vmax.f32 %v262_v48, 0.0  ;;  %v243_v54 = vmul.f32 %v560_v15, %v214_v50 }
  0xe8   :  { %v429_v55 = vpop.f32.mrf.mxu0  ;;  %v445_v56 = vpop.f32.mrf.mxu1 }
  0xe9   :  { %v386_v57 = vpack.c.bf16 %v267_v51, %v267_v51  ;;  %v255_v58 = vadd.f32 %v565_v17, %v235_v52  ;;  %v394_v59 = vpack.c.bf16 %v275_v53, %v275_v53  ;;  %v263_v60 = vadd.f32 %v565_v17, %v243_v54 }
  0xea   :  { %v187_v61 = vpop.f32.mrf.mxu0  ;;  %v219_v62 = vpop.f32.mrf.mxu1 }
  0xeb   :  { %334 = vst.msk [vmem:[%s649_s4 + $0x8] sm:$0xf] %vm331_vm3, %v386_v57  ;;  %v268_v63 = vmax.f32 %v255_v58, 0.0  ;;  %342 = vst.msk [vmem:[%s649_s4 + $0x28] sm:$0xf] %vm331_vm3, %v394_v59  ;;  %v236_v0 = vmul.f32 %v560_v15, %v187_v61  ;;  %v276_v1 = vmax.f32 %v263_v60, 0.0  ;;  %v244_v2 = vmul.f32 %v560_v15, %v219_v62 }
  0xec   :  { %v432_v3 = vpop.f32.mrf.mxu0  ;;  %v448_v4 = vpop.f32.mrf.mxu1 }
  0xed   :  { %v387_v5 = vpack.c.bf16 %v268_v63, %v268_v63  ;;  %v256_v6 = vadd.f32 %v565_v17, %v236_v0  ;;  %v395_v7 = vpack.c.bf16 %v276_v1, %v276_v1  ;;  %v264_v8 = vadd.f32 %v565_v17, %v244_v2 }
  0xee   :  { %v190_v9 = vpop.f32.mrf.mxu0  ;;  %v222_v10 = vpop.f32.mrf.mxu1 }
  0xef   :  { %335 = vst.msk [vmem:[%s649_s4 + $0xc] sm:$0xf] %vm331_vm3, %v387_v5  ;;  %v269_v11 = vmax.f32 %v256_v6, 0.0  ;;  %343 = vst.msk [vmem:[%s649_s4 + $0x2c] sm:$0xf] %vm331_vm3, %v395_v7  ;;  %v237_v12 = vmul.f32 %v560_v15, %v190_v9  ;;  %v277_v13 = vmax.f32 %v264_v8, 0.0 }
  0xf0   :  { %v433_v14 = vpop.f32.mrf.mxu0  ;;  %v449_v16 = vpop.f32.mrf.mxu1 }
  0xf1   :  { %v388_v18 = vpack.c.bf16 %v269_v11, %v269_v11  ;;  %v257_v19 = vadd.f32 %v565_v17, %v237_v12  ;;  %v396_v20 = vpack.c.bf16 %v277_v13, %v277_v13 }
  0xf2   :  { %v195_v21 = vpop.f32.mrf.mxu0 }
  0xf3   :  { %336 = vst.msk [vmem:[%s649_s4 + $0x10] sm:$0xf] %vm331_vm3, %v388_v18  ;;  %v270_v22 = vmax.f32 %v257_v19, 0.0  ;;  %344 = vst.msk [vmem:[%s649_s4 + $0x30] sm:$0xf] %vm331_vm3, %v396_v20  ;;  %v238_v23 = vmul.f32 %v560_v15, %v195_v21 }
  0xf4   :  { %v436_v24 = vpop.f32.mrf.mxu0 }
  0xf5   :  { %v389_v25 = vpack.c.bf16 %v270_v22, %v270_v22  ;;  %v258_v26 = vadd.f32 %v565_v17, %v238_v23 }
  0xf6   :  { %v198_v27 = vpop.f32.mrf.mxu0 }
  0xf7   :  { %337 = vst.msk [vmem:[%s649_s4 + $0x14] sm:$0xf] %vm331_vm3, %v389_v25  ;;  %v271_v28 = vmax.f32 %v258_v26, 0.0  ;;  %v239_v29 = vmul.f32 %v560_v15, %v198_v27 }
  0xf8   :  { %v437_v30 = vpop.f32.mrf.mxu0 }
  0xf9   :  { %v390_v31 = vpack.c.bf16 %v271_v28, %v271_v28  ;;  %v259_v32 = vadd.f32 %v565_v17, %v239_v29 }
  0xfb   :  { %338 = vst.msk [vmem:[%s649_s4 + $0x18] sm:$0xf] %vm331_vm3, %v390_v31  ;;  %v272_v33 = vmax.f32 %v259_v32, 0.0 }
  0xfd   :  { %v391_v34 = vpack.c.bf16 %v272_v33, %v272_v33 }
  0xff   :  { %339 = vst.msk [vmem:[%s649_s4 + $0x1c] sm:$0xf] %vm331_vm3, %v391_v34 }

// kernel: convnet2_forward.6
= control target key start
LH: loop header
LB: loop body
LE: loop exit
PB: predicated region body
PF: predicated region fallthrough
CT: control target
= control target key end

     0   :  { %v314_v0 = vmov 0   ;;  %vm132_vm0 = vcmask 424960   ;;  %vm139_vm1 = vcmask 1041408   ;;  %vm234_vm2 = vcmask 322560   ;;  %s430_s1 = inlined_call_operand.vmem [shape: bf16[180,40], index: 1, kind: input, shape index: {}]   ;;  %s431_s0 = inlined_call_operand.vmem [shape: bf16[32,180], index: 0, kind: input, shape index: {}]   ;;  %s432_s2 = inlined_call_operand.vmem [shape: f32[1,40], index: 2, kind: input, shape index: {}]   ;;  %s433_s3 = inlined_call_operand.vmem [shape: f32[1,40], index: 3, kind: input, shape index: {}]   ;;  %s434_s4 = inlined_call_operand.vmem [shape: bf16[32,40], index: 4, kind: output, shape index: {}]  }
   0x1   :  { %143 = vmatprep.subr.bf16.mxu0 %v314_v0  ;;  %271 = vmatprep.subr.bf16.mxu1 %v314_v0  ;;  %v296_v1 = vld [vmem:[%s430_s1 + $0x38] sm:$0xff]   ;;  %v297_v2 = vld [vmem:[%s430_s1 + $0x30] sm:$0xff]   ;;  %v298_v3 = vld [vmem:[%s430_s1 + $0x28] sm:$0xff]  }
   0x2   :  { %144 = vmatpush1.bf16.msra.mxu0 %v296_v1  ;;  %283 = vmatpush1.bf16.msra.mxu1 %v296_v1  ;;  %v299_v4 = vld [vmem:[%s430_s1 + $0x20] sm:$0xff]   ;;  %v300_v6 = vld [vmem:[%s430_s1 + $0x18] sm:$0xff]   ;;  %v301_v8 = vld [vmem:[%s430_s1 + $0x10] sm:$0xff]  }
   0x3   :  { %145 = vmatprep.subr.bf16.mxu0 %v314_v0  ;;  %272 = vmatprep.subr.bf16.mxu1 %v314_v0  ;;  %v310_v5 = vld [vmem:[%s431_s0 + $0x4] ss:$8 sps:$4 sm:$0xff]   ;;  %v313_v7 = vld [vmem:[%s431_s0 + $0x14] ss:$8 sps:$4 sm:$0xff]   ;;  %v308_v16 = vld [vmem:[%s431_s0] ss:$8 sps:$4 sm:$0xff]  }
   0x4   :  { %259 = vmatprep.mubr.msk.bf16.mxu0 %vm132_vm0, %v310_v5  ;;  %260 = vmatprep.mubr.msk.bf16.mxu1 %vm132_vm0, %v313_v7  ;;  %v302_v9 = vld [vmem:[%s430_s1 + $0x8] sm:$0xff]   ;;  %v303_v10 = vld [vmem:[%s430_s1] sm:$0xff]   ;;  %v304_v11 = vld [vmem:[%s430_s1 + $0x58] ss:$0 sps:$4 sm:$0x33]  }
   0x5   :  { %v141_v12 = vsel %vm139_vm1, %v304_v11, 0  ;;  %v305_v13 = vld [vmem:[%s430_s1 + $0x50] sm:$0xff]   ;;  %v306_v14 = vld [vmem:[%s430_s1 + $0x48] sm:$0xff]   ;;  %v307_v15 = vld [vmem:[%s430_s1 + $0x40] sm:$0xff]  }
   0x6   :  { %146 = vmatpush1.bf16.msra.mxu0 %v297_v2  ;;  %284 = vmatpush1.bf16.msra.mxu1 %v297_v2  ;;  %v311_v17 = vld [vmem:[%s431_s0 + $0x10] ss:$8 sps:$4 sm:$0xff]   ;;  %v261_v18 = vld [vmem:[%s432_s2] ss:$0 sm:$0xff] }
   0x7   :  { %147 = vmatprep.subr.bf16.mxu0 %v314_v0  ;;  %273 = vmatprep.subr.bf16.mxu1 %v314_v0  ;;  %v262_v20 = vld [vmem:[%s433_s3] ss:$0 sm:$0xff] }
   0xa   :  { %148 = vmatpush1.bf16.msra.mxu0 %v298_v3  ;;  %285 = vmatpush1.bf16.msra.mxu1 %v298_v3 }
   0xb   :  { %149 = vmatprep.subr.bf16.mxu0 %v314_v0  ;;  %274 = vmatprep.subr.bf16.mxu1 %v314_v0 }
   0xe   :  { %150 = vmatpush1.bf16.msra.mxu0 %v299_v4  ;;  %286 = vmatpush1.bf16.msra.mxu1 %v299_v4 }
   0xf   :  { %151 = vmatprep.subr.bf16.mxu0 %v314_v0  ;;  %275 = vmatprep.subr.bf16.mxu1 %v314_v0 }
  0x12   :  { %152 = vmatpush1.bf16.msra.mxu0 %v300_v6  ;;  %287 = vmatpush1.bf16.msra.mxu1 %v300_v6 }
  0x13   :  { %153 = vmatprep.subr.bf16.mxu0 %v314_v0  ;;  %276 = vmatprep.subr.bf16.mxu1 %v314_v0 }
  0x16   :  { %154 = vmatpush1.bf16.msra.mxu0 %v301_v8  ;;  %288 = vmatpush1.bf16.msra.mxu1 %v301_v8 }
  0x17   :  { %155 = vmatprep.subr.bf16.mxu0 %v314_v0  ;;  %277 = vmatprep.subr.bf16.mxu1 %v314_v0 }
  0x1a   :  { %156 = vmatpush1.bf16.msra.mxu0 %v302_v9  ;;  %289 = vmatpush1.bf16.msra.mxu1 %v302_v9 }
  0x1b   :  { %157 = vmatprep.subr.bf16.mxu0 %v314_v0  ;;  %278 = vmatprep.subr.bf16.mxu1 %v314_v0 }
  0x1e   :  { %158 = vmatpush1.bf16.msra.mxu0 %v303_v10  ;;  %290 = vmatpush1.bf16.msra.mxu1 %v303_v10 }
  0x1f   :  { %167 = vmatprep.subr.bf16.mxu0 %v314_v0  ;;  %279 = vmatprep.subr.bf16.mxu1 %v314_v0 }
  0x22   :  { %168 = vmatpush2.bf16.msra.mxu0 %v141_v12  ;;  %291 = vmatpush2.bf16.msra.mxu1 %v141_v12 }
  0x23   :  { %169 = vmatprep.subr.bf16.mxu0 %v314_v0  ;;  %280 = vmatprep.subr.bf16.mxu1 %v314_v0 }
  0x26   :  { %170 = vmatpush2.bf16.msra.mxu0 %v305_v13  ;;  %292 = vmatpush2.bf16.msra.mxu1 %v305_v13 }
  0x27   :  { %171 = vmatprep.subr.bf16.mxu0 %v314_v0  ;;  %281 = vmatprep.subr.bf16.mxu1 %v314_v0 }
  0x2a   :  { %172 = vmatpush2.bf16.msra.mxu0 %v306_v14  ;;  %293 = vmatpush2.bf16.msra.mxu1 %v306_v14 }
  0x2b   :  { %173 = vmatprep.subr.bf16.mxu0 %v314_v0  ;;  %282 = vmatprep.subr.bf16.mxu1 %v314_v0 }
  0x2e   :  { %174 = vmatpush2.bf16.msra.mxu0 %v307_v15  ;;  %294 = vmatpush2.bf16.msra.mxu1 %v307_v15 }
  0x31   :  { %176 = vmatmul.mubr.bf16.vlgmr.msra.gmra.mxu0 %v308_v16  ;;  %184 = vmatmul.mubr.bf16.vlgmr.msra.gmra.mxu1 %v311_v17 }
  0xf1   :  { %v177_v19 = vpop.f32.mrf.mxu0  ;;  %v185_v21 = vpop.f32.mrf.mxu1 }
  0xf2   :  { %v199_v22 = vmul.f32 %v261_v18, %v177_v19  ;;  %v201_v23 = vmul.f32 %v261_v18, %v185_v21 }
  0xf3   :  { %v179_v24 = vpop.f32.mrf.mxu0  ;;  %v187_v25 = vpop.f32.mrf.mxu1 }
  0xf4   :  { %v210_v26 = vadd.f32 %v262_v20, %v199_v22  ;;  %v212_v27 = vadd.f32 %v262_v20, %v201_v23 }
  0xf5   :  { %v180_v28 = vpop.f32.mrf.mxu0  ;;  %v188_v29 = vpop.f32.mrf.mxu1 }
  0xf6   :  { %v214_v30 = vmax.f32 %v210_v26, 0.0  ;;  %v216_v31 = vmax.f32 %v212_v27, 0.0  ;;  %v200_v32 = vmul.f32 %v261_v18, %v180_v28  ;;  %v202_v33 = vmul.f32 %v261_v18, %v188_v29 }
  0xf7   :  { %v182_v34 = vpop.f32.mrf.mxu0  ;;  %v190_v35 = vpop.f32.mrf.mxu1 }
  0xf8   :  { %v267_v36 = vpack.c.bf16 %v214_v30, %v214_v30  ;;  %v269_v37 = vpack.c.bf16 %v216_v31, %v216_v31  ;;  %v211_v38 = vadd.f32 %v262_v20, %v200_v32  ;;  %v213_v39 = vadd.f32 %v262_v20, %v202_v33 }
  0xfa   :  { %235 = vst.msk [vmem:[%s434_s4] sm:$0xf] %vm234_vm2, %v267_v36  ;;  %237 = vst.msk [vmem:[%s434_s4 + $0x8] sm:$0xf] %vm234_vm2, %v269_v37  ;;  %v215_v40 = vmax.f32 %v211_v38, 0.0  ;;  %v217_v41 = vmax.f32 %v213_v39, 0.0 }
  0xfc   :  { %v268_v42 = vpack.c.bf16 %v215_v40, %v215_v40  ;;  %v270_v43 = vpack.c.bf16 %v217_v41, %v217_v41 }
  0xfe   :  { %236 = vst.msk [vmem:[%s434_s4 + $0x4] sm:$0xf] %vm234_vm2, %v268_v42  ;;  %238 = vst.msk [vmem:[%s434_s4 + $0xc] sm:$0xf] %vm234_vm2, %v270_v43 }

// kernel: convnet2_forward.7
= control target key start
LH: loop header
LB: loop body
LE: loop exit
PB: predicated region body
PF: predicated region fallthrough
CT: control target
= control target key end

     0   :  { %v989_v36 = vmov 0.0   ;;  %vm990_vm0 = vmmov 0   ;;  %vm584_vm1 = vcmask 1043456   ;;  %vm680_vm2 = vcmask 1045504   ;;  %s1253_s1 = inlined_call_operand.vmem [shape: bf16[640,120], index: 1, kind: input, shape index: {}]   ;;  %s1254_s0 = inlined_call_operand.vmem [shape: bf16[8,640], index: 0, kind: input, shape index: {}]   ;;  %s1255_s4 = inlined_call_operand.vmem [shape: bf16[120,60], index: 4, kind: input, shape index: {}]   ;;  %s1256_s7 = inlined_call_operand.vmem [shape: bf16[60,10], index: 7, kind: input, shape index: {}]   ;;  %s1257_s2 = inlined_call_operand.vmem [shape: f32[1,120], index: 2, kind: input, shape index: {}]   ;;  %s1258_s3 = inlined_call_operand.vmem [shape: f32[1,120], index: 3, kind: input, shape index: {}]   ;;  %s1259_s5 = inlined_call_operand.vmem [shape: f32[1,60], index: 5, kind: input, shape index: {}]   ;;  %s1260_s6 = inlined_call_operand.vmem [shape: f32[1,60], index: 6, kind: input, shape index: {}]   ;;  %s1261_s8 = inlined_call_operand.vmem [shape: f32[1,10], index: 8, kind: input, shape index: {}]   ;;  %s1262_s9 = inlined_call_operand.vmem [shape: f32[8,10], index: 9, kind: output, shape index: {}]  }
   0x1   :  { %v928_v0 = vld [vmem:[%s1253_s1 + $0x78] sm:$0xff]   ;;  %v932_v4 = vld [vmem:[%s1253_s1 + $0x70] sm:$0xff]   ;;  %v936_v8 = vld [vmem:[%s1253_s1 + $0x68] sm:$0xff]   ;;  %vm580_vm3 = vcmask 982016   ;;  %vm676_vm4 = vcmask 490496   ;;  %vm724_vm5 = vcmask 80896  }
   0x2   :  { %v929_v1 = vld [vmem:[%s1253_s1 + $0xf8] sm:$0xff]   ;;  %807 = vmatprep.subr.bf16.mxu0 %v928_v0  ;;  %v933_v5 = vld [vmem:[%s1253_s1 + $0xf0] sm:$0xff]   ;;  %v937_v9 = vld [vmem:[%s1253_s1 + $0xe8] sm:$0xff]  }
   0x3   :  { %v930_v2 = vld [vmem:[%s1253_s1 + $0x38] sm:$0xff]   ;;  %829 = vmatprep.subr.bf16.mxu1 %v929_v1  ;;  %v934_v6 = vld [vmem:[%s1253_s1 + $0x30] sm:$0xff]   ;;  %v938_v10 = vld [vmem:[%s1253_s1 + $0x28] sm:$0xff]  }
   0x4   :  { %v931_v3 = vld [vmem:[%s1253_s1 + $0xb8] sm:$0xff]   ;;  %808 = vmatpush3.bf16.msra.mxu0 %v930_v2  ;;  %v935_v7 = vld [vmem:[%s1253_s1 + $0xb0] sm:$0xff]   ;;  %v939_v11 = vld [vmem:[%s1253_s1 + $0xa8] sm:$0xff]  }
   0x5   :  { %830 = vmatpush3.bf16.msra.mxu1 %v931_v3  ;;  %809 = vmatprep.subr.bf16.mxu0 %v932_v4  ;;  %v940_v12 = vld [vmem:[%s1253_s1 + $0x60] sm:$0xff]   ;;  %v944_v16 = vld [vmem:[%s1253_s1 + $0x58] sm:$0xff]   ;;  %v948_v20 = vld [vmem:[%s1253_s1 + $0x50] sm:$0xff]  }
   0x6   :  { %831 = vmatprep.subr.bf16.mxu1 %v933_v5  ;;  %v941_v13 = vld [vmem:[%s1253_s1 + $0xe0] sm:$0xff]   ;;  %v945_v17 = vld [vmem:[%s1253_s1 + $0xd8] sm:$0xff]   ;;  %v949_v21 = vld [vmem:[%s1253_s1 + $0xd0] sm:$0xff]  }
   0x7   :  { %v942_v14 = vld [vmem:[%s1253_s1 + $0x20] sm:$0xff]   ;;  %v946_v18 = vld [vmem:[%s1253_s1 + $0x18] sm:$0xff]   ;;  %v950_v22 = vld [vmem:[%s1253_s1 + $0x10] sm:$0xff]  }
   0x8   :  { %810 = vmatpush3.bf16.msra.mxu0 %v934_v6  ;;  %v943_v15 = vld [vmem:[%s1253_s1 + $0xa0] sm:$0xff]   ;;  %v947_v19 = vld [vmem:[%s1253_s1 + $0x98] sm:$0xff]   ;;  %v951_v23 = vld [vmem:[%s1253_s1 + $0x90] sm:$0xff]  }
   0x9   :  { %832 = vmatpush3.bf16.msra.mxu1 %v935_v7  ;;  %811 = vmatprep.subr.bf16.mxu0 %v936_v8  ;;  %v952_v24 = vld [vmem:[%s1253_s1 + $0x48] sm:$0xff]   ;;  %v956_v28 = vld [vmem:[%s1253_s1 + $0x40] sm:$0xff]   ;;  %v965_v39 = vld [vmem:[%s1253_s1 + $0x138] sm:$0xff]  }
   0xa   :  { %833 = vmatprep.subr.bf16.mxu1 %v937_v9  ;;  %v953_v25 = vld [vmem:[%s1253_s1 + $0xc8] sm:$0xff]   ;;  %v957_v29 = vld [vmem:[%s1253_s1 + $0xc0] sm:$0xff]   ;;  %v966_v40 = vld [vmem:[%s1253_s1 + $0x130] sm:$0xff]  }
   0xb   :  { %v954_v26 = vld [vmem:[%s1253_s1 + $0x8] sm:$0xff]   ;;  %v958_v30 = vld [vmem:[%s1253_s1] sm:$0xff]   ;;  %v969_v43 = vld [vmem:[%s1253_s1 + $0x118] sm:$0xff]  }
   0xc   :  { %812 = vmatpush3.bf16.msra.mxu0 %v938_v10  ;;  %v955_v27 = vld [vmem:[%s1253_s1 + $0x88] sm:$0xff]   ;;  %v959_v31 = vld [vmem:[%s1253_s1 + $0x80] sm:$0xff]   ;;  %v970_v44 = vld [vmem:[%s1253_s1 + $0x110] sm:$0xff]  }
   0xd   :  { %834 = vmatpush3.bf16.msra.mxu1 %v939_v11  ;;  %813 = vmatprep.subr.bf16.mxu0 %v940_v12  ;;  %v136_v32 = vld [vmem:[%s1254_s0] sm:$0xff]  ;;  %v137_v35 = vld [vmem:[%s1254_s0 + $0x8] sm:$0xff]  ;;  %v962_v47 = vld [vmem:[%s1254_s0 + $0x10] ss:$0 sps:$4 sm:$0xff]  }
   0xe   :  { %835 = vmatprep.subr.bf16.mxu1 %v941_v13  ;;  %v743_v33 = vcombine.low %v136_v32, %v136_v32  ;;  %v744_v34 = vcombine.high %v136_v32, %v136_v32  ;;  %v745_v37 = vcombine.low %v137_v35, %v137_v35  ;;  %v746_v38 = vcombine.high %v137_v35, %v137_v35  ;;  %v967_v41 = vld [vmem:[%s1253_s1 + $0x128] sm:$0xff]   ;;  %v968_v42 = vld [vmem:[%s1253_s1 + $0x120] sm:$0xff]   ;;  %v973_v48 = vld [vmem:[%s1255_s4 + $0x38] ss:$0 sps:$4 sm:$0xff]  }
   0xf   :  { %v971_v45 = vld [vmem:[%s1253_s1 + $0x108] sm:$0xff]   ;;  %v972_v46 = vld [vmem:[%s1253_s1 + $0x100] sm:$0xff]   ;;  %v586_v49 = vsel %vm584_vm1, %v973_v48, 0  ;;  %v974_v50 = vld [vmem:[%s1255_s4 + $0x30] sm:$0xff]  }
  0x10   :  { %814 = vmatpush3.bf16.msra.mxu0 %v942_v14  ;;  %429 = vmatprep.mubr.bf16.mxu0 %v744_v34  ;;  %v975_v51 = vld [vmem:[%s1255_s4 + $0x28] sm:$0xff]   ;;  %v976_v52 = vld [vmem:[%s1255_s4 + $0x20] sm:$0xff]   ;;  %v977_v53 = vld [vmem:[%s1255_s4 + $0x18] sm:$0xff]  }
  0x11   :  { %836 = vmatpush3.bf16.msra.mxu1 %v943_v15  ;;  %815 = vmatprep.subr.bf16.mxu0 %v944_v16  ;;  %v978_v54 = vld [vmem:[%s1255_s4 + $0x10] sm:$0xff]   ;;  %v979_v55 = vld [vmem:[%s1255_s4 + $0x8] sm:$0xff]   ;;  %v980_v56 = vld [vmem:[%s1255_s4] sm:$0xff]  }
  0x12   :  { %837 = vmatprep.subr.bf16.mxu1 %v945_v17  ;;  %469 = vmatprep.mubr.bf16.mxu1 %v746_v38  ;;  %v981_v57 = vld [vmem:[%s1256_s7 + $0x18] sm:$0x3f]   ;;  %v982_v59 = vld [vmem:[%s1256_s7 + $0x10] sm:$0xff]   ;;  %v788_v8 = vld [vmem:[%s1257_s2] ss:$0 sm:$0xff] }
  0x13   :  { %v682_v58 = vsel %vm680_vm2, %v981_v57, 0  ;;  %v789_v10 = vld [vmem:[%s1258_s3] ss:$0 sm:$0xff] }
  0x14   :  { %816 = vmatpush3.bf16.msra.mxu0 %v946_v18  ;;  %v983_v18 = vld [vmem:[%s1256_s7 + $0x8] sm:$0xff]  }
  0x15   :  { %838 = vmatpush3.bf16.msra.mxu1 %v947_v19  ;;  %817 = vmatprep.subr.bf16.mxu0 %v948_v20  ;;  %v984_v19 = vld [vmem:[%s1256_s7] sm:$0xff]  }
  0x16   :  { %839 = vmatprep.subr.bf16.mxu1 %v949_v21  ;;  %v799_v20 = vld [vmem:[%s1259_s5] ss:$0 sm:$0xff] }
  0x18   :  { %818 = vmatpush3.bf16.msra.mxu0 %v950_v22  ;;  %v800_v22 = vld [vmem:[%s1260_s6] ss:$0 sm:$0xff] }
  0x19   :  { %840 = vmatpush3.bf16.msra.mxu1 %v951_v23  ;;  %819 = vmatprep.subr.bf16.mxu0 %v952_v24 }
  0x1a   :  { %841 = vmatprep.subr.bf16.mxu1 %v953_v25 }
  0x1c   :  { %820 = vmatpush3.bf16.msra.mxu0 %v954_v26 }
  0x1d   :  { %842 = vmatpush3.bf16.msra.mxu1 %v955_v27  ;;  %821 = vmatprep.subr.bf16.mxu0 %v956_v28 }
  0x1e   :  { %843 = vmatprep.subr.bf16.mxu1 %v957_v29 }
  0x20   :  { %822 = vmatpush3.bf16.msra.mxu0 %v958_v30  ;;  %v801_v30 = vld [vmem:[%s1261_s8] ss:$0 sm:$0xff] }
  0x21   :  { %844 = vmatpush3.bf16.msra.mxu1 %v959_v31  ;;  %874 = vmatprep.subr.bf16.mxu0 %v989_v36 }
  0x22   :  { %894 = vmatprep.subr.bf16.mxu1 %v989_v36 }
  0x23   :  { %430 = vmatmul.mubr.bf16.vlgmr.msra.gmra.mxu0 %v743_v33 }
  0x24   :  { %470 = vmatmul.mubr.bf16.vlgmr.msra.gmra.mxu1 %v745_v37  ;;  %875 = vmatpush3.bf16.msra.mxu0 %v965_v39 }
  0x25   :  { %876 = vmatprep.subr.bf16.mxu0 %v989_v36  ;;  %890 = vmatprep.mubr.msk.bf16.mxu0 %vm990_vm0, %v989_v36 }
  0x26   :  { %910 = vmatprep.mubr.msk.bf16.mxu1 %vm990_vm0, %v989_v36  ;;  %895 = vmatpush3.bf16.msra.mxu1 %v586_v49 }
  0x27   :  { %896 = vmatprep.subr.bf16.mxu1 %v989_v36 }
  0x28   :  { %877 = vmatpush3.bf16.msra.mxu0 %v966_v40 }
  0x29   :  { %878 = vmatprep.subr.bf16.mxu0 %v989_v36 }
  0x2a   :  { %897 = vmatpush3.bf16.msra.mxu1 %v974_v50 }
  0x2b   :  { %898 = vmatprep.subr.bf16.mxu1 %v989_v36 }
  0x2c   :  { %879 = vmatpush3.bf16.msra.mxu0 %v967_v41 }
  0x2d   :  { %880 = vmatprep.subr.bf16.mxu0 %v989_v36 }
  0x2e   :  { %899 = vmatpush3.bf16.msra.mxu1 %v975_v51 }
  0x2f   :  { %900 = vmatprep.subr.bf16.mxu1 %v989_v36 }
  0x30   :  { %881 = vmatpush3.bf16.msra.mxu0 %v968_v42 }
  0x31   :  { %882 = vmatprep.subr.bf16.mxu0 %v989_v36 }
  0x32   :  { %901 = vmatpush3.bf16.msra.mxu1 %v976_v52 }
  0x33   :  { %902 = vmatprep.subr.bf16.mxu1 %v989_v36 }
  0x34   :  { %883 = vmatpush3.bf16.msra.mxu0 %v969_v43 }
  0x35   :  { %884 = vmatprep.subr.bf16.mxu0 %v989_v36 }
  0x36   :  { %903 = vmatpush3.bf16.msra.mxu1 %v977_v53 }
  0x37   :  { %904 = vmatprep.subr.bf16.mxu1 %v989_v36 }
  0x38   :  { %885 = vmatpush3.bf16.msra.mxu0 %v970_v44 }
  0x39   :  { %886 = vmatprep.subr.bf16.mxu0 %v989_v36 }
  0x3a   :  { %905 = vmatpush3.bf16.msra.mxu1 %v978_v54 }
  0x3b   :  { %906 = vmatprep.subr.bf16.mxu1 %v989_v36 }
  0x3c   :  { %887 = vmatpush3.bf16.msra.mxu0 %v971_v45 }
  0x3d   :  { %888 = vmatprep.subr.bf16.mxu0 %v989_v36 }
  0x3e   :  { %907 = vmatpush3.bf16.msra.mxu1 %v979_v55 }
  0x3f   :  { %908 = vmatprep.subr.bf16.mxu1 %v989_v36 }
  0x40   :  { %889 = vmatpush3.bf16.msra.mxu0 %v972_v46 }
  0x41   :  { %914 = vmatprep.subr.bf16.mxu0 %v989_v36 }
  0x42   :  { %909 = vmatpush3.bf16.msra.mxu1 %v980_v56 }
  0x43   :  { %891 = vmatmul.mubr.bf16.vlgmr.msra.gmra.mxu0 %v962_v47 }
  0x44   :  { %922 = vmatprep.mubr.msk.bf16.mxu0 %vm990_vm0, %v989_v36  ;;  %915 = vmatpush3.bf16.msra.mxu0 %v682_v58 }
  0x45   :  { %916 = vmatprep.subr.bf16.mxu0 %v989_v36 }
  0x48   :  { %917 = vmatpush3.bf16.msra.mxu0 %v982_v59 }
  0x49   :  { %918 = vmatprep.subr.bf16.mxu0 %v989_v36 }
  0x4c   :  { %919 = vmatpush3.bf16.msra.mxu0 %v983_v18 }
  0x4d   :  { %920 = vmatprep.subr.bf16.mxu0 %v989_v36 }
  0x50   :  { %921 = vmatpush3.bf16.msra.mxu0 %v984_v19 }
  0xe3   :  { %v823_v60 = vpop.f32.mrf.mxu0 }
  0xe4   :  { %v845_v61 = vpop.f32.mrf.mxu1 }
  0xe5   :  { %v824_v62 = vpop.f32.mrf.mxu0 }
  0xe6   :  { %v846_v63 = vpop.f32.mrf.mxu1  ;;  %v825_v4 = vadd.f32 %v824_v62, %v823_v60 }
  0xe7   :  { %v826_v0 = vpop.f32.mrf.mxu0  ;;  %v847_v5 = vadd.f32 %v846_v63, %v845_v61 }
  0xe8   :  { %v848_v1 = vpop.f32.mrf.mxu1 }
  0xe9   :  { %v827_v2 = vpop.f32.mrf.mxu0  ;;  %v472_v6 = vadd.f32 %v847_v5, %v825_v4 }
  0xea   :  { %v849_v3 = vpop.f32.mrf.mxu1 }
 0x103   :  { %v511_v7 = vpop.f32.mrf.mxu0 }
 0x104   :  { %v512_v9 = vadd.f32 %v511_v7, %v472_v6 }
 0x105   :  { %v892_v11 = vpop.f32.mrf.mxu0 }
 0x106   :  { %v524_v12 = vmul.f32 %v788_v8, %v512_v9 }
 0x107   :  { %v514_v13 = vpop.f32.mrf.mxu0 }
 0x108   :  { %v532_v14 = vadd.f32 %v789_v10, %v524_v12 }
 0x109   :  { %v893_v15 = vpop.f32.mrf.mxu0 }
 0x10a   :  { %v533_v16 = vmax.f32 %v532_v14, 0.0 }
 0x10c   :  { %v534_v17 = vpack.c.bf16 %v533_v16, %v533_v16 }
 0x10e   :  { %911 = vmatmul.mubr.msk.bf16.vlgmr.msra.gmra.mxu1 %vm580_vm3, %v534_v17 }
 0x1ce   :  { %v622_v21 = vpop.f32.mrf.mxu1 }
 0x1cf   :  { %v635_v23 = vmul.f32 %v799_v20, %v622_v21 }
 0x1d0   :  { %v912_v24 = vpop.f32.mrf.mxu1 }
 0x1d1   :  { %v643_v25 = vadd.f32 %v800_v22, %v635_v23 }
 0x1d2   :  { %v625_v26 = vpop.f32.mrf.mxu1 }
 0x1d3   :  { %v644_v27 = vmax.f32 %v643_v25, 0.0 }
 0x1d4   :  { %v913_v28 = vpop.f32.mrf.mxu1 }
 0x1d5   :  { %v645_v29 = vpack.c.bf16 %v644_v27, %v644_v27 }
 0x1d7   :  { %923 = vmatmul.mubr.msk.bf16.vlgmr.msra.gmra.mxu0 %vm676_vm4, %v645_v29 }
 0x297   :  { %v718_v31 = vpop.f32.mrf.mxu0 }
 0x298   :  { %v719_v32 = vadd.f32 %v801_v30, %v718_v31 }
 0x299   :  { %v924_v33 = vpop.f32.mrf.mxu0 }
 0x29a   :  { %v725_v34 = vsel %vm724_vm5, %v719_v32, -inf }
 0x29b   :  { %726 = vmax.xlane.f32.xlu0 %v725_v34  ;;  %v721_v35 = vpop.f32.mrf.mxu0 }
 0x29d   :  { %v925_v36 = vpop.f32.mrf.mxu0 }
 0x324   :  { %v727_v37 = vpop.xlane.xlu0 %726 }
 0x325   :  { %v728_v38 = vsub.f32 %v719_v32, %v727_v37 }
 0x327   :  { %v729_v39 = vmul.f32 1.442695, %v728_v38 }
 0x329   :  { %985 = vpow2.f32 %v729_v39 }
 0x336   :  { %v986_v40 = vpop.eup %985 }
 0x337   :  { %v731_v41 = vsel %vm724_vm5, %v986_v40, 0.0 }
 0x338   :  { %732 = vadd.xlane.f32.xlu0 %v731_v41 }
 0x3c1   :  { %v733_v42 = vpop.xlane.xlu0 %732 }
 0x3c2   :  { %987 = vlog2.f32 %v733_v42 }
 0x3cf   :  { %v988_v43 = vpop.eup %987 }
 0x3d0   :  { %v735_v44 = vmul.f32 0.6931472, %v988_v43 }
 0x3d2   :  { %v736_v45 = vadd.f32 %v735_v44, %v727_v37 }
 0x3d4   :  { %v737_v46 = vsub.f32 %v719_v32, %v736_v45 }
 0x3d6   :  { %738 = vst.msk [vmem:[%s1262_s9] sm:$0xff] %vm724_vm5, %v737_v46 }

</bundles_post_ra>
